<compile_context>
chip_gen: v6e
topology: v6e:2x2x1
jax: 0.10.0
libtpu: 0.0.40
codegen_flags: <defaults>
</compile_context>

<pallas_src>
import jax
import jax.numpy as jnp
from jax.experimental import pallas as pl
from jax.experimental.pallas import tpu as pltpu

# ---- small synthetic BERT config (stand-in for bert-base-uncased) ----
B = 4              # batch (number of sequences)
S = 8              # sequence length
D = 32             # hidden size
H = 4              # attention heads
DH = D // H        # head dim
INTER = 64         # FFN intermediate size
LAYERS = 2         # transformer layers
VOCAB = 64         # vocab size
SEQS_PER_TILE = 2  # sequences folded into one matmul M-tile
TM = SEQS_PER_TILE * S   # rows per tile (matmul M dimension)


# -------------------------- in-kernel helpers --------------------------

def _layernorm(x, g, b):
    mu = jnp.mean(x, axis=-1, keepdims=True)
    xc = x - mu
    var = jnp.mean(xc * xc, axis=-1, keepdims=True)
    return xc * jax.lax.rsqrt(var + 1e-12) * g + b


def _erf(x):
    # Abramowitz & Stegun 7.1.26 (|error| <= 1.5e-7): exp/abs/where only,
    # all guaranteed Mosaic lowerings.
    a1, a2, a3, a4, a5 = (0.254829592, -0.284496736, 1.421413741,
                          -1.453152027, 1.061405429)
    pp = 0.3275911
    ax = jnp.abs(x)
    t = 1.0 / (1.0 + pp * ax)
    poly = ((((a5 * t + a4) * t + a3) * t + a2) * t + a1) * t
    y = 1.0 - poly * jnp.exp(-ax * ax)
    return jnp.where(x >= 0, y, -y)


def _gelu_erf(x):
    # Exact (erf-based) GELU, matching HF/PyTorch BERT's "gelu" activation.
    return 0.5 * x * (1.0 + _erf(x * 0.7071067811865476))


# -------------------------- fused encoder kernel --------------------------

def _bert_encoder_kernel(
    emb_ref, mask_ref, eg_ref, eb_ref,
    wqkv_ref, bqkv_ref, wo_ref, bo_ref, ln1g_ref, ln1b_ref,
    w1_ref, b1_ref, w2_ref, b2_ref, ln2g_ref, ln2b_ref,
    out_ref, ctx_ref,
):
    layer = pl.program_id(1)

    # Layer 0 (per row tile): embedding LayerNorm written straight into the
    # layer-resident output block (out_ref doubles as the activation, so it is
    # correctly re-keyed every time the row-tile index changes).
    @pl.when(layer == 0)
    def _():
        out_ref[...] = _layernorm(emb_ref[...], eg_ref[...], eb_ref[...])

    x = out_ref[...]                       # (TM, D) f32, VMEM-resident activation
    add_mask = mask_ref[...]               # (SEQS_PER_TILE, 1, S) additive mask

    # ---- fused QKV projection on the MXU (bf16 operands, f32 accumulate) ----
    qkv = jnp.dot(x.astype(jnp.bfloat16), wqkv_ref[...],
                  preferred_element_type=jnp.float32)
    qkv = qkv + bqkv_ref[...]              # (TM, 3D) f32

    q3 = qkv[:, 0 * D:1 * D].reshape(SEQS_PER_TILE, S, D)
    k3 = qkv[:, 1 * D:2 * D].reshape(SEQS_PER_TILE, S, D)
    v3 = qkv[:, 2 * D:3 * D].reshape(SEQS_PER_TILE, S, D)

    # ---- per-head attention, batched over the folded sequences, on the MXU ----
    for h in range(H):
        sl = slice(h * DH, (h + 1) * DH)
        qh = q3[:, :, sl].astype(jnp.bfloat16)        # (nb, S, DH)
        kh = k3[:, :, sl].astype(jnp.bfloat16)
        vh = v3[:, :, sl].astype(jnp.bfloat16)
        s = jnp.einsum('bqd,bkd->bqk', qh, kh,
                       preferred_element_type=jnp.float32)      # (nb, S, S)
        s = s + add_mask
        s = s - jnp.max(s, axis=-1, keepdims=True)
        p = jnp.exp(s)
        p = p * pl.reciprocal(jnp.sum(p, axis=-1, keepdims=True), approx=True)
        ch = jnp.einsum('bqk,bkd->bqd', p.astype(jnp.bfloat16), vh,
                        preferred_element_type=jnp.float32)     # (nb, S, DH)
        # Write this head's context at its lane offset (no concatenate).
        ctx_ref[:, :, sl] = ch

    ctx = ctx_ref[...].reshape(TM, D).astype(jnp.bfloat16)      # lane-dense (TM, D)

    # ---- output projection + residual + LayerNorm (fused) ----
    attn = jnp.dot(ctx, wo_ref[...], preferred_element_type=jnp.float32)
    attn = attn + bo_ref[...]
    x1 = _layernorm(attn + x, ln1g_ref[...], ln1b_ref[...])

    # ---- FFN (exact GELU) + residual + LayerNorm (fused) ----
    hdn = jnp.dot(x1.astype(jnp.bfloat16), w1_ref[...],
                  preferred_element_type=jnp.float32)
    hdn = _gelu_erf(hdn + b1_ref[...])
    ffn = jnp.dot(hdn.astype(jnp.bfloat16), w2_ref[...],
                  preferred_element_type=jnp.float32)
    ffn = ffn + b2_ref[...]
    out_ref[...] = _layernorm(ffn + x1, ln2g_ref[...], ln2b_ref[...])


def bert_encoder(emb2d, add_mask, emb_ln_g, emb_ln_b,
                 wqkv, bqkv, wo, bo, ln1g, ln1b, w1, b1, w2, b2, ln2g, ln2b):
    """Whole stacked encoder in one pallas_call.

    emb2d: (B*S, D) summed embeddings, batch folded into the matmul M axis.
    grid = (row_tiles, layers); the layer axis is innermost/'arbitrary' so the
    output block (indexed only by row tile) stays VMEM-resident across layers;
    the row-tile axis is 'parallel' for megacore sharding.
    """
    Mtot, Dv = emb2d.shape
    Bv, _, Sv = add_mask.shape
    L = wqkv.shape[0]
    inter = w1.shape[-1]
    nb = SEQS_PER_TILE
    tm = nb * Sv
    m_tiles = Bv // nb

    act = pl.BlockSpec((tm, Dv), lambda m, l: (m, 0))
    mask = pl.BlockSpec((nb, 1, Sv), lambda m, l: (m, 0, 0))
    const2d = lambda r, c: pl.BlockSpec((r, c), lambda m, l: (0, 0))
    perlayer = lambda r, c: pl.BlockSpec((None, r, c), lambda m, l: (l, 0, 0))

    return pl.pallas_call(
        _bert_encoder_kernel,
        out_shape=jax.ShapeDtypeStruct((Mtot, Dv), jnp.float32),
        grid_spec=pltpu.PrefetchScalarGridSpec(
            num_scalar_prefetch=0,
            grid=(m_tiles, L),
            in_specs=[
                act,                                          # summed embeddings (read at layer 0)
                mask,                                         # additive attention mask
                const2d(1, Dv), const2d(1, Dv),               # embedding LN gamma / beta
                perlayer(Dv, 3 * Dv), perlayer(1, 3 * Dv),    # wqkv (bf16), bqkv
                perlayer(Dv, Dv), perlayer(1, Dv),            # wo (bf16), bo
                perlayer(1, Dv), perlayer(1, Dv),             # ln1 gamma / beta
                perlayer(Dv, inter), perlayer(1, inter),      # w1 (bf16), b1
                perlayer(inter, Dv), perlayer(1, Dv),         # w2 (bf16), b2
                perlayer(1, Dv), perlayer(1, Dv),             # ln2 gamma / beta
            ],
            out_specs=act,                                    # layer-resident activation
            scratch_shapes=[pltpu.VMEM((nb, Sv, Dv), jnp.float32)],   # ctx slab
        ),
        compiler_params=pltpu.CompilerParams(
            dimension_semantics=("parallel", "arbitrary"),
            vmem_limit_bytes=48 * 1024 * 1024,
        ),
    )(emb2d, add_mask, emb_ln_g, emb_ln_b,
      wqkv, bqkv, wo, bo, ln1g, ln1b, w1, b1, w2, b2, ln2g, ln2b)


# -------------------------- parameter init --------------------------

def init_params(key):
    def norm(key, shape, scale=0.02):
        return scale * jax.random.normal(key, shape, dtype=jnp.float32)

    keys = iter(jax.random.split(key, 8 + LAYERS * 8))
    params = {
        "word_emb": norm(next(keys), (VOCAB, D)),
        "pos_emb": norm(next(keys), (S, D)),
        "type_emb": norm(next(keys), (2, D)),
        "emb_ln_g": jnp.ones((D,), jnp.float32),
        "emb_ln_b": jnp.zeros((D,), jnp.float32),
        "layers": [],
    }
    for _ in range(LAYERS):
        layer = {
            "wq": norm(next(keys), (D, D)), "bq": jnp.zeros((D,), jnp.float32),
            "wk": norm(next(keys), (D, D)), "bk": jnp.zeros((D,), jnp.float32),
            "wv": norm(next(keys), (D, D)), "bv": jnp.zeros((D,), jnp.float32),
            "wo": norm(next(keys), (D, D)), "bo": jnp.zeros((D,), jnp.float32),
            "ln1_g": jnp.ones((D,), jnp.float32),
            "ln1_b": jnp.zeros((D,), jnp.float32),
            "w1": norm(next(keys), (D, INTER)),
            "b1": jnp.zeros((INTER,), jnp.float32),
            "w2": norm(next(keys), (INTER, D)),
            "b2": jnp.zeros((D,), jnp.float32),
            "ln2_g": jnp.ones((D,), jnp.float32),
            "ln2_b": jnp.zeros((D,), jnp.float32),
        }
        params["layers"].append(layer)
    return params


# -------------------------- forward pass --------------------------

def text_encoder_forward(params, input_ids, attention_mask):
    """Mirrors TextEncoder.forward: run BERT, return last_hidden_state[:, 0, :]."""
    # Embedding gather + sum (plain-JAX glue); LayerNorm happens in the kernel.
    we = params["word_emb"][input_ids]                 # (B, S, D)
    pe = params["pos_emb"][None, :, :]                 # (1, S, D)
    te = params["type_emb"][0][None, None, :]          # token_type_ids == 0
    emb = (we + pe + te).reshape(B * S, D)             # fold batch into M

    # Additive attention mask: 0 where attended, -1e9 where padded.
    add_mask = ((1.0 - attention_mask.astype(jnp.float32)) * -1e9).reshape(B, 1, S)

    # Stack per-layer weights (trace-time glue): fuse wq|wk|wv, fold the
    # 1/sqrt(head_dim) scale into wq/bq (in f32), then cast matmul weights to
    # bf16; biases and LayerNorm params stay f32.
    layers = params["layers"]
    scale = 1.0 / (DH ** 0.5)
    stack = lambda f: jnp.stack([f(l) for l in layers])
    bf16 = lambda a: a.astype(jnp.bfloat16)
    wqkv = bf16(stack(lambda l: jnp.concatenate(
        [l["wq"] * scale, l["wk"], l["wv"]], axis=1)))                # (L, D, 3D)
    bqkv = stack(lambda l: jnp.concatenate(
        [l["bq"] * scale, l["bk"], l["bv"]], axis=0)[None, :])        # (L, 1, 3D)
    wo = bf16(stack(lambda l: l["wo"]))
    bo = stack(lambda l: l["bo"][None, :])
    ln1g = stack(lambda l: l["ln1_g"][None, :])
    ln1b = stack(lambda l: l["ln1_b"][None, :])
    w1 = bf16(stack(lambda l: l["w1"]))
    b1 = stack(lambda l: l["b1"][None, :])
    w2 = bf16(stack(lambda l: l["w2"]))
    b2 = stack(lambda l: l["b2"][None, :])
    ln2g = stack(lambda l: l["ln2_g"][None, :])
    ln2b = stack(lambda l: l["ln2_b"][None, :])

    x_out = bert_encoder(
        emb, add_mask,
        params["emb_ln_g"][None, :], params["emb_ln_b"][None, :],
        wqkv, bqkv, wo, bo, ln1g, ln1b, w1, b1, w2, b2, ln2g, ln2b)

    # target_token_idx = 0 (CLS token)
    return x_out.reshape(B, S, D)[:, 0, :]             # (B, D)


# -------------------------- main --------------------------

if __name__ == "__main__":
    key = jax.random.PRNGKey(0)
    k_param, k_ids = jax.random.split(key)

    params = init_params(k_param)

    input_ids = jax.random.randint(k_ids, (B, S), 0, VOCAB, dtype=jnp.int32)
    attention_mask = jnp.ones((B, S), dtype=jnp.int32)
    attention_mask = attention_mask.at[1, S - 2:].set(0)   # pad last 2 tokens of row 1
    attention_mask = attention_mask.at[3, S - 3:].set(0)   # pad last 3 tokens of row 3

    cls_embedding = jax.jit(text_encoder_forward)(params, input_ids, attention_mask)
    cls_embedding = jax.block_until_ready(cls_embedding)

    assert cls_embedding.shape == (B, D)
    assert cls_embedding.dtype == jnp.float32
    assert bool(jnp.all(jnp.isfinite(cls_embedding)))

    print("KERNEL_OK")
</pallas_src>

<mosaic_0001>
module attributes {stable_mosaic.version = 11 : i64} {
  func.func @_bert_encoder_kernel(%arg0: i32, %arg1: i32, %arg2: memref<16x32xf32, #tpu.memory_space<vmem>>, %arg3: memref<2x1x8xf32, #tpu.memory_space<vmem>>, %arg4: memref<1x32xf32, #tpu.memory_space<vmem>>, %arg5: memref<1x32xf32, #tpu.memory_space<vmem>>, %arg6: memref<1x32x96xbf16, #tpu.memory_space<vmem>>, %arg7: memref<1x1x96xf32, #tpu.memory_space<vmem>>, %arg8: memref<1x32x32xbf16, #tpu.memory_space<vmem>>, %arg9: memref<1x1x32xf32, #tpu.memory_space<vmem>>, %arg10: memref<1x1x32xf32, #tpu.memory_space<vmem>>, %arg11: memref<1x1x32xf32, #tpu.memory_space<vmem>>, %arg12: memref<1x32x64xbf16, #tpu.memory_space<vmem>>, %arg13: memref<1x1x64xf32, #tpu.memory_space<vmem>>, %arg14: memref<1x64x32xbf16, #tpu.memory_space<vmem>>, %arg15: memref<1x1x32xf32, #tpu.memory_space<vmem>>, %arg16: memref<1x1x32xf32, #tpu.memory_space<vmem>>, %arg17: memref<1x1x32xf32, #tpu.memory_space<vmem>>, %arg18: memref<16x32xf32, #tpu.memory_space<vmem>>, %arg19: memref<2x8x32xf32, #tpu.memory_space<vmem>>) attributes {dimension_semantics = [#tpu.dimension_semantics<parallel>, #tpu.dimension_semantics<arbitrary>], iteration_bounds = array<i64: 2, 2>, scalar_prefetch = 0 : i64, scratch_operands = 1 : i64, tpu.core_type = #tpu.core_type<tc>, window_params = [{transform_indices = @transform_0, window_bounds = array<i64: 16, 32>}, {transform_indices = @transform_1, window_bounds = array<i64: 2, 1, 8>}, {pipeline_mode = #tpu.pipeline_mode<synchronous>, transform_indices = @transform_2, window_bounds = array<i64: 1, 32>}, {pipeline_mode = #tpu.pipeline_mode<synchronous>, transform_indices = @transform_3, window_bounds = array<i64: 1, 32>}, {transform_indices = @transform_4, window_bounds = array<i64: 1, 32, 96>}, {transform_indices = @transform_5, window_bounds = array<i64: 1, 1, 96>}, {transform_indices = @transform_6, window_bounds = array<i64: 1, 32, 32>}, {transform_indices = @transform_7, window_bounds = array<i64: 1, 1, 32>}, {transform_indices = @transform_8, window_bounds = array<i64: 1, 1, 32>}, {transform_indices = @transform_9, window_bounds = array<i64: 1, 1, 32>}, {transform_indices = @transform_10, window_bounds = array<i64: 1, 32, 64>}, {transform_indices = @transform_11, window_bounds = array<i64: 1, 1, 64>}, {transform_indices = @transform_12, window_bounds = array<i64: 1, 64, 32>}, {transform_indices = @transform_13, window_bounds = array<i64: 1, 1, 32>}, {transform_indices = @transform_14, window_bounds = array<i64: 1, 1, 32>}, {transform_indices = @transform_15, window_bounds = array<i64: 1, 1, 32>}, {transform_indices = @transform_16, window_bounds = array<i64: 16, 32>}]} {
    %c0_i32 = arith.constant 0 : i32
    %0 = arith.cmpi eq, %arg1, %c0_i32 : i32
    %1 = arith.extui %0 : i1 to i32
    %c0_i32_0 = arith.constant 0 : i32
    %2 = arith.cmpi ne, %1, %c0_i32_0 : i32
    scf.if %2 {
      %c0_99 = arith.constant 0 : index
      %c0_100 = arith.constant 0 : index
      %224 = vector.load %arg2[%c0_99, %c0_100] : memref<16x32xf32, #tpu.memory_space<vmem>>, vector<16x32xf32>
      %c0_101 = arith.constant 0 : index
      %c0_102 = arith.constant 0 : index
      %225 = vector.load %arg4[%c0_101, %c0_102] : memref<1x32xf32, #tpu.memory_space<vmem>>, vector<1x32xf32>
      %c0_103 = arith.constant 0 : index
      %c0_104 = arith.constant 0 : index
      %226 = vector.load %arg5[%c0_103, %c0_104] : memref<1x32xf32, #tpu.memory_space<vmem>>, vector<1x32xf32>
      %cst_105 = arith.constant dense<0.000000e+00> : vector<16xf32>
      %227 = vector.multi_reduction <add>, %224, %cst_105 [1] : vector<16x32xf32> to vector<16xf32>
      %228 = vector.shape_cast %227 : vector<16xf32> to vector<16x1xf32>
      %cst_106 = arith.constant 3.200000e+01 : f32
      %229 = vector.broadcast %cst_106 : f32 to vector<16x1xf32>
      %230 = arith.divf %228, %229 : vector<16x1xf32>
      %231 = vector.broadcast %230 : vector<16x1xf32> to vector<16x32xf32>
      %232 = arith.subf %224, %231 : vector<16x32xf32>
      %233 = arith.mulf %232, %232 : vector<16x32xf32>
      %cst_107 = arith.constant dense<0.000000e+00> : vector<16xf32>
      %234 = vector.multi_reduction <add>, %233, %cst_107 [1] : vector<16x32xf32> to vector<16xf32>
      %235 = vector.shape_cast %234 : vector<16xf32> to vector<16x1xf32>
      %cst_108 = arith.constant 3.200000e+01 : f32
      %236 = vector.broadcast %cst_108 : f32 to vector<16x1xf32>
      %237 = arith.divf %235, %236 : vector<16x1xf32>
      %cst_109 = arith.constant 9.99999996E-13 : f32
      %238 = vector.broadcast %cst_109 : f32 to vector<16x1xf32>
      %239 = arith.addf %237, %238 : vector<16x1xf32>
      %240 = math.rsqrt %239 : vector<16x1xf32>
      %241 = vector.broadcast %240 : vector<16x1xf32> to vector<16x32xf32>
      %242 = arith.mulf %232, %241 : vector<16x32xf32>
      %243 = vector.broadcast %225 : vector<1x32xf32> to vector<16x32xf32>
      %244 = arith.mulf %242, %243 : vector<16x32xf32>
      %245 = vector.broadcast %226 : vector<1x32xf32> to vector<16x32xf32>
      %246 = arith.addf %244, %245 : vector<16x32xf32>
      %c0_110 = arith.constant 0 : index
      %c0_111 = arith.constant 0 : index
      %247 = vector.load %arg18[%c0_110, %c0_111] : memref<16x32xf32, #tpu.memory_space<vmem>>, vector<16x32xf32>
      tpu.vector_store %arg18[%c0_110, %c0_111], %246 {strides = array<i32>} : memref<16x32xf32, #tpu.memory_space<vmem>>, vector<16x32xf32>,
    } else {
    }
    %c0 = arith.constant 0 : index
    %c0_1 = arith.constant 0 : index
    %3 = vector.load %arg18[%c0, %c0_1] : memref<16x32xf32, #tpu.memory_space<vmem>>, vector<16x32xf32>
    %c0_2 = arith.constant 0 : index
    %c0_3 = arith.constant 0 : index
    %c0_4 = arith.constant 0 : index
    %4 = vector.load %arg3[%c0_2, %c0_3, %c0_4] : memref<2x1x8xf32, #tpu.memory_space<vmem>>, vector<2x1x8xf32>
    %5 = arith.truncf %3 : vector<16x32xf32> to vector<16x32xbf16>
    %c0_5 = arith.constant 0 : index
    %c0_6 = arith.constant 0 : index
    %c0_7 = arith.constant 0 : index
    %6 = vector.load %arg6[%c0_5, %c0_6, %c0_7] : memref<1x32x96xbf16, #tpu.memory_space<vmem>>, vector<1x32x96xbf16>
    %7 = vector.shape_cast %6 : vector<1x32x96xbf16> to vector<32x96xbf16>
    %cst = arith.constant dense<0.000000e+00> : vector<16x96xf32>
    %8 = tpu.matmul %5, %7, %cst {dimension_numbers = #tpu.dot_dimension_numbers<[1], [0], [0], [1], [0, 0, 1, 1], [], []>} : vector<16x32xbf16>, vector<32x96xbf16>, vector<16x96xf32> -> vector<16x96xf32>
    %c0_8 = arith.constant 0 : index
    %c0_9 = arith.constant 0 : index
    %c0_10 = arith.constant 0 : index
    %9 = vector.load %arg7[%c0_8, %c0_9, %c0_10] : memref<1x1x96xf32, #tpu.memory_space<vmem>>, vector<1x1x96xf32>
    %10 = vector.shape_cast %9 : vector<1x1x96xf32> to vector<1x96xf32>
    %11 = vector.broadcast %10 : vector<1x96xf32> to vector<16x96xf32>
    %12 = arith.addf %8, %11 : vector<16x96xf32>
    %13 = vector.extract_strided_slice %12 {offsets = [0, 0], sizes = [16, 32], strides = [1, 1]} : vector<16x96xf32> to vector<16x32xf32>
    %14 = vector.shape_cast %13 : vector<16x32xf32> to vector<2x8x32xf32>
    %15 = vector.extract_strided_slice %12 {offsets = [0, 32], sizes = [16, 32], strides = [1, 1]} : vector<16x96xf32> to vector<16x32xf32>
    %16 = vector.shape_cast %15 : vector<16x32xf32> to vector<2x8x32xf32>
    %17 = vector.extract_strided_slice %12 {offsets = [0, 64], sizes = [16, 32], strides = [1, 1]} : vector<16x96xf32> to vector<16x32xf32>
    %18 = vector.shape_cast %17 : vector<16x32xf32> to vector<2x8x32xf32>
    %19 = vector.extract_strided_slice %14 {offsets = [0, 0, 0], sizes = [2, 8, 8], strides = [1, 1, 1]} : vector<2x8x32xf32> to vector<2x8x8xf32>
    %20 = arith.truncf %19 : vector<2x8x8xf32> to vector<2x8x8xbf16>
    %21 = vector.extract_strided_slice %16 {offsets = [0, 0, 0], sizes = [2, 8, 8], strides = [1, 1, 1]} : vector<2x8x32xf32> to vector<2x8x8xf32>
    %22 = arith.truncf %21 : vector<2x8x8xf32> to vector<2x8x8xbf16>
    %23 = vector.extract_strided_slice %18 {offsets = [0, 0, 0], sizes = [2, 8, 8], strides = [1, 1, 1]} : vector<2x8x32xf32> to vector<2x8x8xf32>
    %24 = arith.truncf %23 : vector<2x8x8xf32> to vector<2x8x8xbf16>
    "tpu.trace_start"() <{level = 10 : i32, message = "bqd,bkd->bqk"}> : () -> ()
    %cst_11 = arith.constant dense<0.000000e+00> : vector<2x8x8xf32>
    %25 = tpu.matmul %20, %22, %cst_11 {dimension_numbers = #tpu.dot_dimension_numbers<[2], [2], [1], [1], [0, 0, 0, 1, 1, 1], [0], [0]>} : vector<2x8x8xbf16>, vector<2x8x8xbf16>, vector<2x8x8xf32> -> vector<2x8x8xf32>
    "tpu.trace_stop"() : () -> ()
    %26 = vector.broadcast %4 : vector<2x1x8xf32> to vector<2x8x8xf32>
    %27 = arith.addf %25, %26 : vector<2x8x8xf32>
    %cst_12 = arith.constant dense<0xFF800000> : vector<2x8xf32>
    %28 = vector.multi_reduction <maximumf>, %27, %cst_12 [2] : vector<2x8x8xf32> to vector<2x8xf32>
    %29 = vector.shape_cast %28 : vector<2x8xf32> to vector<2x8x1xf32>
    %30 = vector.broadcast %29 : vector<2x8x1xf32> to vector<2x8x8xf32>
    %31 = arith.subf %27, %30 : vector<2x8x8xf32>
    %32 = math.exp %31 : vector<2x8x8xf32>
    %cst_13 = arith.constant dense<0.000000e+00> : vector<2x8xf32>
    %33 = vector.multi_reduction <add>, %32, %cst_13 [2] : vector<2x8x8xf32> to vector<2x8xf32>
    %34 = vector.shape_cast %33 : vector<2x8xf32> to vector<2x8x1xf32>
    %35 = tpu.reciprocal %34 {approx = true} : vector<2x8x1xf32> -> vector<2x8x1xf32>
    %36 = vector.broadcast %35 : vector<2x8x1xf32> to vector<2x8x8xf32>
    %37 = arith.mulf %32, %36 : vector<2x8x8xf32>
    %38 = arith.truncf %37 : vector<2x8x8xf32> to vector<2x8x8xbf16>
    "tpu.trace_start"() <{level = 10 : i32, message = "bqk,bkd->bqd"}> : () -> ()
    %cst_14 = arith.constant dense<0.000000e+00> : vector<2x8x8xf32>
    %39 = tpu.matmul %38, %24, %cst_14 {dimension_numbers = #tpu.dot_dimension_numbers<[2], [1], [1], [2], [0, 0, 0, 1, 1, 2], [0], [0]>} : vector<2x8x8xbf16>, vector<2x8x8xbf16>, vector<2x8x8xf32> -> vector<2x8x8xf32>
    "tpu.trace_stop"() : () -> ()
    %c0_15 = arith.constant 0 : index
    %c0_16 = arith.constant 0 : index
    %c0_17 = arith.constant 0 : index
    %40 = vector.load %arg19[%c0_15, %c0_16, %c0_17] : memref<2x8x32xf32, #tpu.memory_space<vmem>>, vector<2x8x8xf32>
    tpu.vector_store %arg19[%c0_15, %c0_16, %c0_17], %39 {strides = array<i32>} : memref<2x8x32xf32, #tpu.memory_space<vmem>>, vector<2x8x8xf32>,
    %41 = vector.extract_strided_slice %14 {offsets = [0, 0, 8], sizes = [2, 8, 8], strides = [1, 1, 1]} : vector<2x8x32xf32> to vector<2x8x8xf32>
    %42 = arith.truncf %41 : vector<2x8x8xf32> to vector<2x8x8xbf16>
    %43 = vector.extract_strided_slice %16 {offsets = [0, 0, 8], sizes = [2, 8, 8], strides = [1, 1, 1]} : vector<2x8x32xf32> to vector<2x8x8xf32>
    %44 = arith.truncf %43 : vector<2x8x8xf32> to vector<2x8x8xbf16>
    %45 = vector.extract_strided_slice %18 {offsets = [0, 0, 8], sizes = [2, 8, 8], strides = [1, 1, 1]} : vector<2x8x32xf32> to vector<2x8x8xf32>
    %46 = arith.truncf %45 : vector<2x8x8xf32> to vector<2x8x8xbf16>
    "tpu.trace_start"() <{level = 10 : i32, message = "bqd,bkd->bqk"}> : () -> ()
    %cst_18 = arith.constant dense<0.000000e+00> : vector<2x8x8xf32>
    %47 = tpu.matmul %42, %44, %cst_18 {dimension_numbers = #tpu.dot_dimension_numbers<[2], [2], [1], [1], [0, 0, 0, 1, 1, 1], [0], [0]>} : vector<2x8x8xbf16>, vector<2x8x8xbf16>, vector<2x8x8xf32> -> vector<2x8x8xf32>
    "tpu.trace_stop"() : () -> ()
    %48 = vector.broadcast %4 : vector<2x1x8xf32> to vector<2x8x8xf32>
    %49 = arith.addf %47, %48 : vector<2x8x8xf32>
    %cst_19 = arith.constant dense<0xFF800000> : vector<2x8xf32>
    %50 = vector.multi_reduction <maximumf>, %49, %cst_19 [2] : vector<2x8x8xf32> to vector<2x8xf32>
    %51 = vector.shape_cast %50 : vector<2x8xf32> to vector<2x8x1xf32>
    %52 = vector.broadcast %51 : vector<2x8x1xf32> to vector<2x8x8xf32>
    %53 = arith.subf %49, %52 : vector<2x8x8xf32>
    %54 = math.exp %53 : vector<2x8x8xf32>
    %cst_20 = arith.constant dense<0.000000e+00> : vector<2x8xf32>
    %55 = vector.multi_reduction <add>, %54, %cst_20 [2] : vector<2x8x8xf32> to vector<2x8xf32>
    %56 = vector.shape_cast %55 : vector<2x8xf32> to vector<2x8x1xf32>
    %57 = tpu.reciprocal %56 {approx = true} : vector<2x8x1xf32> -> vector<2x8x1xf32>
    %58 = vector.broadcast %57 : vector<2x8x1xf32> to vector<2x8x8xf32>
    %59 = arith.mulf %54, %58 : vector<2x8x8xf32>
    %60 = arith.truncf %59 : vector<2x8x8xf32> to vector<2x8x8xbf16>
    "tpu.trace_start"() <{level = 10 : i32, message = "bqk,bkd->bqd"}> : () -> ()
    %cst_21 = arith.constant dense<0.000000e+00> : vector<2x8x8xf32>
    %61 = tpu.matmul %60, %46, %cst_21 {dimension_numbers = #tpu.dot_dimension_numbers<[2], [1], [1], [2], [0, 0, 0, 1, 1, 2], [0], [0]>} : vector<2x8x8xbf16>, vector<2x8x8xbf16>, vector<2x8x8xf32> -> vector<2x8x8xf32>
    "tpu.trace_stop"() : () -> ()
    %c0_22 = arith.constant 0 : index
    %c0_23 = arith.constant 0 : index
    %c8 = arith.constant 8 : index
    %62 = vector.load %arg19[%c0_22, %c0_23, %c8] : memref<2x8x32xf32, #tpu.memory_space<vmem>>, vector<2x8x8xf32>
    tpu.vector_store %arg19[%c0_22, %c0_23, %c8], %61 {strides = array<i32>} : memref<2x8x32xf32, #tpu.memory_space<vmem>>, vector<2x8x8xf32>,
    %63 = vector.extract_strided_slice %14 {offsets = [0, 0, 16], sizes = [2, 8, 8], strides = [1, 1, 1]} : vector<2x8x32xf32> to vector<2x8x8xf32>
    %64 = arith.truncf %63 : vector<2x8x8xf32> to vector<2x8x8xbf16>
    %65 = vector.extract_strided_slice %16 {offsets = [0, 0, 16], sizes = [2, 8, 8], strides = [1, 1, 1]} : vector<2x8x32xf32> to vector<2x8x8xf32>
    %66 = arith.truncf %65 : vector<2x8x8xf32> to vector<2x8x8xbf16>
    %67 = vector.extract_strided_slice %18 {offsets = [0, 0, 16], sizes = [2, 8, 8], strides = [1, 1, 1]} : vector<2x8x32xf32> to vector<2x8x8xf32>
    %68 = arith.truncf %67 : vector<2x8x8xf32> to vector<2x8x8xbf16>
    "tpu.trace_start"() <{level = 10 : i32, message = "bqd,bkd->bqk"}> : () -> ()
    %cst_24 = arith.constant dense<0.000000e+00> : vector<2x8x8xf32>
    %69 = tpu.matmul %64, %66, %cst_24 {dimension_numbers = #tpu.dot_dimension_numbers<[2], [2], [1], [1], [0, 0, 0, 1, 1, 1], [0], [0]>} : vector<2x8x8xbf16>, vector<2x8x8xbf16>, vector<2x8x8xf32> -> vector<2x8x8xf32>
    "tpu.trace_stop"() : () -> ()
    %70 = vector.broadcast %4 : vector<2x1x8xf32> to vector<2x8x8xf32>
    %71 = arith.addf %69, %70 : vector<2x8x8xf32>
    %cst_25 = arith.constant dense<0xFF800000> : vector<2x8xf32>
    %72 = vector.multi_reduction <maximumf>, %71, %cst_25 [2] : vector<2x8x8xf32> to vector<2x8xf32>
    %73 = vector.shape_cast %72 : vector<2x8xf32> to vector<2x8x1xf32>
    %74 = vector.broadcast %73 : vector<2x8x1xf32> to vector<2x8x8xf32>
    %75 = arith.subf %71, %74 : vector<2x8x8xf32>
    %76 = math.exp %75 : vector<2x8x8xf32>
    %cst_26 = arith.constant dense<0.000000e+00> : vector<2x8xf32>
    %77 = vector.multi_reduction <add>, %76, %cst_26 [2] : vector<2x8x8xf32> to vector<2x8xf32>
    %78 = vector.shape_cast %77 : vector<2x8xf32> to vector<2x8x1xf32>
    %79 = tpu.reciprocal %78 {approx = true} : vector<2x8x1xf32> -> vector<2x8x1xf32>
    %80 = vector.broadcast %79 : vector<2x8x1xf32> to vector<2x8x8xf32>
    %81 = arith.mulf %76, %80 : vector<2x8x8xf32>
    %82 = arith.truncf %81 : vector<2x8x8xf32> to vector<2x8x8xbf16>
    "tpu.trace_start"() <{level = 10 : i32, message = "bqk,bkd->bqd"}> : () -> ()
    %cst_27 = arith.constant dense<0.000000e+00> : vector<2x8x8xf32>
    %83 = tpu.matmul %82, %68, %cst_27 {dimension_numbers = #tpu.dot_dimension_numbers<[2], [1], [1], [2], [0, 0, 0, 1, 1, 2], [0], [0]>} : vector<2x8x8xbf16>, vector<2x8x8xbf16>, vector<2x8x8xf32> -> vector<2x8x8xf32>
    "tpu.trace_stop"() : () -> ()
    %c0_28 = arith.constant 0 : index
    %c0_29 = arith.constant 0 : index
    %c16 = arith.constant 16 : index
    %84 = vector.load %arg19[%c0_28, %c0_29, %c16] : memref<2x8x32xf32, #tpu.memory_space<vmem>>, vector<2x8x8xf32>
    tpu.vector_store %arg19[%c0_28, %c0_29, %c16], %83 {strides = array<i32>} : memref<2x8x32xf32, #tpu.memory_space<vmem>>, vector<2x8x8xf32>,
    %85 = vector.extract_strided_slice %14 {offsets = [0, 0, 24], sizes = [2, 8, 8], strides = [1, 1, 1]} : vector<2x8x32xf32> to vector<2x8x8xf32>
    %86 = arith.truncf %85 : vector<2x8x8xf32> to vector<2x8x8xbf16>
    %87 = vector.extract_strided_slice %16 {offsets = [0, 0, 24], sizes = [2, 8, 8], strides = [1, 1, 1]} : vector<2x8x32xf32> to vector<2x8x8xf32>
    %88 = arith.truncf %87 : vector<2x8x8xf32> to vector<2x8x8xbf16>
    %89 = vector.extract_strided_slice %18 {offsets = [0, 0, 24], sizes = [2, 8, 8], strides = [1, 1, 1]} : vector<2x8x32xf32> to vector<2x8x8xf32>
    %90 = arith.truncf %89 : vector<2x8x8xf32> to vector<2x8x8xbf16>
    "tpu.trace_start"() <{level = 10 : i32, message = "bqd,bkd->bqk"}> : () -> ()
    %cst_30 = arith.constant dense<0.000000e+00> : vector<2x8x8xf32>
    %91 = tpu.matmul %86, %88, %cst_30 {dimension_numbers = #tpu.dot_dimension_numbers<[2], [2], [1], [1], [0, 0, 0, 1, 1, 1], [0], [0]>} : vector<2x8x8xbf16>, vector<2x8x8xbf16>, vector<2x8x8xf32> -> vector<2x8x8xf32>
    "tpu.trace_stop"() : () -> ()
    %92 = vector.broadcast %4 : vector<2x1x8xf32> to vector<2x8x8xf32>
    %93 = arith.addf %91, %92 : vector<2x8x8xf32>
    %cst_31 = arith.constant dense<0xFF800000> : vector<2x8xf32>
    %94 = vector.multi_reduction <maximumf>, %93, %cst_31 [2] : vector<2x8x8xf32> to vector<2x8xf32>
    %95 = vector.shape_cast %94 : vector<2x8xf32> to vector<2x8x1xf32>
    %96 = vector.broadcast %95 : vector<2x8x1xf32> to vector<2x8x8xf32>
    %97 = arith.subf %93, %96 : vector<2x8x8xf32>
    %98 = math.exp %97 : vector<2x8x8xf32>
    %cst_32 = arith.constant dense<0.000000e+00> : vector<2x8xf32>
    %99 = vector.multi_reduction <add>, %98, %cst_32 [2] : vector<2x8x8xf32> to vector<2x8xf32>
    %100 = vector.shape_cast %99 : vector<2x8xf32> to vector<2x8x1xf32>
    %101 = tpu.reciprocal %100 {approx = true} : vector<2x8x1xf32> -> vector<2x8x1xf32>
    %102 = vector.broadcast %101 : vector<2x8x1xf32> to vector<2x8x8xf32>
    %103 = arith.mulf %98, %102 : vector<2x8x8xf32>
    %104 = arith.truncf %103 : vector<2x8x8xf32> to vector<2x8x8xbf16>
    "tpu.trace_start"() <{level = 10 : i32, message = "bqk,bkd->bqd"}> : () -> ()
    %cst_33 = arith.constant dense<0.000000e+00> : vector<2x8x8xf32>
    %105 = tpu.matmul %104, %90, %cst_33 {dimension_numbers = #tpu.dot_dimension_numbers<[2], [1], [1], [2], [0, 0, 0, 1, 1, 2], [0], [0]>} : vector<2x8x8xbf16>, vector<2x8x8xbf16>, vector<2x8x8xf32> -> vector<2x8x8xf32>
    "tpu.trace_stop"() : () -> ()
    %c0_34 = arith.constant 0 : index
    %c0_35 = arith.constant 0 : index
    %c24 = arith.constant 24 : index
    %106 = vector.load %arg19[%c0_34, %c0_35, %c24] : memref<2x8x32xf32, #tpu.memory_space<vmem>>, vector<2x8x8xf32>
    tpu.vector_store %arg19[%c0_34, %c0_35, %c24], %105 {strides = array<i32>} : memref<2x8x32xf32, #tpu.memory_space<vmem>>, vector<2x8x8xf32>,
    %c0_36 = arith.constant 0 : index
    %c0_37 = arith.constant 0 : index
    %c0_38 = arith.constant 0 : index
    %107 = vector.load %arg19[%c0_36, %c0_37, %c0_38] : memref<2x8x32xf32, #tpu.memory_space<vmem>>, vector<2x8x32xf32>
    %108 = vector.shape_cast %107 : vector<2x8x32xf32> to vector<16x32xf32>
    %109 = arith.truncf %108 : vector<16x32xf32> to vector<16x32xbf16>
    %c0_39 = arith.constant 0 : index
    %c0_40 = arith.constant 0 : index
    %c0_41 = arith.constant 0 : index
    %110 = vector.load %arg8[%c0_39, %c0_40, %c0_41] : memref<1x32x32xbf16, #tpu.memory_space<vmem>>, vector<1x32x32xbf16>
    %111 = vector.shape_cast %110 : vector<1x32x32xbf16> to vector<32x32xbf16>
    %cst_42 = arith.constant dense<0.000000e+00> : vector<16x32xf32>
    %112 = tpu.matmul %109, %111, %cst_42 {dimension_numbers = #tpu.dot_dimension_numbers<[1], [0], [0], [1], [0, 0, 1, 1], [], []>} : vector<16x32xbf16>, vector<32x32xbf16>, vector<16x32xf32> -> vector<16x32xf32>
    %c0_43 = arith.constant 0 : index
    %c0_44 = arith.constant 0 : index
    %c0_45 = arith.constant 0 : index
    %113 = vector.load %arg9[%c0_43, %c0_44, %c0_45] : memref<1x1x32xf32, #tpu.memory_space<vmem>>, vector<1x1x32xf32>
    %114 = vector.shape_cast %113 : vector<1x1x32xf32> to vector<1x32xf32>
    %115 = vector.broadcast %114 : vector<1x32xf32> to vector<16x32xf32>
    %116 = arith.addf %112, %115 : vector<16x32xf32>
    %117 = arith.addf %116, %3 : vector<16x32xf32>
    %c0_46 = arith.constant 0 : index
    %c0_47 = arith.constant 0 : index
    %c0_48 = arith.constant 0 : index
    %118 = vector.load %arg10[%c0_46, %c0_47, %c0_48] : memref<1x1x32xf32, #tpu.memory_space<vmem>>, vector<1x1x32xf32>
    %119 = vector.shape_cast %118 : vector<1x1x32xf32> to vector<1x32xf32>
    %c0_49 = arith.constant 0 : index
    %c0_50 = arith.constant 0 : index
    %c0_51 = arith.constant 0 : index
    %120 = vector.load %arg11[%c0_49, %c0_50, %c0_51] : memref<1x1x32xf32, #tpu.memory_space<vmem>>, vector<1x1x32xf32>
    %121 = vector.shape_cast %120 : vector<1x1x32xf32> to vector<1x32xf32>
    %cst_52 = arith.constant dense<0.000000e+00> : vector<16xf32>
    %122 = vector.multi_reduction <add>, %117, %cst_52 [1] : vector<16x32xf32> to vector<16xf32>
    %123 = vector.shape_cast %122 : vector<16xf32> to vector<16x1xf32>
    %cst_53 = arith.constant 3.200000e+01 : f32
    %124 = vector.broadcast %cst_53 : f32 to vector<16x1xf32>
    %125 = arith.divf %123, %124 : vector<16x1xf32>
    %126 = vector.broadcast %125 : vector<16x1xf32> to vector<16x32xf32>
    %127 = arith.subf %117, %126 : vector<16x32xf32>
    %128 = arith.mulf %127, %127 : vector<16x32xf32>
    %cst_54 = arith.constant dense<0.000000e+00> : vector<16xf32>
    %129 = vector.multi_reduction <add>, %128, %cst_54 [1] : vector<16x32xf32> to vector<16xf32>
    %130 = vector.shape_cast %129 : vector<16xf32> to vector<16x1xf32>
    %cst_55 = arith.constant 3.200000e+01 : f32
    %131 = vector.broadcast %cst_55 : f32 to vector<16x1xf32>
    %132 = arith.divf %130, %131 : vector<16x1xf32>
    %cst_56 = arith.constant 9.99999996E-13 : f32
    %133 = vector.broadcast %cst_56 : f32 to vector<16x1xf32>
    %134 = arith.addf %132, %133 : vector<16x1xf32>
    %135 = math.rsqrt %134 : vector<16x1xf32>
    %136 = vector.broadcast %135 : vector<16x1xf32> to vector<16x32xf32>
    %137 = arith.mulf %127, %136 : vector<16x32xf32>
    %138 = vector.broadcast %119 : vector<1x32xf32> to vector<16x32xf32>
    %139 = arith.mulf %137, %138 : vector<16x32xf32>
    %140 = vector.broadcast %121 : vector<1x32xf32> to vector<16x32xf32>
    %141 = arith.addf %139, %140 : vector<16x32xf32>
    %142 = arith.truncf %141 : vector<16x32xf32> to vector<16x32xbf16>
    %c0_57 = arith.constant 0 : index
    %c0_58 = arith.constant 0 : index
    %c0_59 = arith.constant 0 : index
    %143 = vector.load %arg12[%c0_57, %c0_58, %c0_59] : memref<1x32x64xbf16, #tpu.memory_space<vmem>>, vector<1x32x64xbf16>
    %144 = vector.shape_cast %143 : vector<1x32x64xbf16> to vector<32x64xbf16>
    %cst_60 = arith.constant dense<0.000000e+00> : vector<16x64xf32>
    %145 = tpu.matmul %142, %144, %cst_60 {dimension_numbers = #tpu.dot_dimension_numbers<[1], [0], [0], [1], [0, 0, 1, 1], [], []>} : vector<16x32xbf16>, vector<32x64xbf16>, vector<16x64xf32> -> vector<16x64xf32>
    %c0_61 = arith.constant 0 : index
    %c0_62 = arith.constant 0 : index
    %c0_63 = arith.constant 0 : index
    %146 = vector.load %arg13[%c0_61, %c0_62, %c0_63] : memref<1x1x64xf32, #tpu.memory_space<vmem>>, vector<1x1x64xf32>
    %147 = vector.shape_cast %146 : vector<1x1x64xf32> to vector<1x64xf32>
    %148 = vector.broadcast %147 : vector<1x64xf32> to vector<16x64xf32>
    %149 = arith.addf %145, %148 : vector<16x64xf32>
    %cst_64 = arith.constant 5.000000e-01 : f32
    %150 = vector.broadcast %cst_64 : f32 to vector<16x64xf32>
    %151 = arith.mulf %150, %149 : vector<16x64xf32>
    %cst_65 = arith.constant 0.707106769 : f32
    %152 = vector.broadcast %cst_65 : f32 to vector<16x64xf32>
    %153 = arith.mulf %149, %152 : vector<16x64xf32>
    %154 = math.absf %153 : vector<16x64xf32>
    %cst_66 = arith.constant 0.327591091 : f32
    %155 = vector.broadcast %cst_66 : f32 to vector<16x64xf32>
    %156 = arith.mulf %155, %154 : vector<16x64xf32>
    %cst_67 = arith.constant 1.000000e+00 : f32
    %157 = vector.broadcast %cst_67 : f32 to vector<16x64xf32>
    %158 = arith.addf %157, %156 : vector<16x64xf32>
    %cst_68 = arith.constant 1.000000e+00 : f32
    %159 = vector.broadcast %cst_68 : f32 to vector<16x64xf32>
    %160 = arith.divf %159, %158 : vector<16x64xf32>
    %cst_69 = arith.constant 1.06140542 : f32
    %161 = vector.broadcast %cst_69 : f32 to vector<16x64xf32>
    %162 = arith.mulf %161, %160 : vector<16x64xf32>
    %cst_70 = arith.constant -1.45315206 : f32
    %163 = vector.broadcast %cst_70 : f32 to vector<16x64xf32>
    %164 = arith.addf %162, %163 : vector<16x64xf32>
    %165 = arith.mulf %164, %160 : vector<16x64xf32>
    %cst_71 = arith.constant 1.42141378 : f32
    %166 = vector.broadcast %cst_71 : f32 to vector<16x64xf32>
    %167 = arith.addf %165, %166 : vector<16x64xf32>
    %168 = arith.mulf %167, %160 : vector<16x64xf32>
    %cst_72 = arith.constant -0.284496725 : f32
    %169 = vector.broadcast %cst_72 : f32 to vector<16x64xf32>
    %170 = arith.addf %168, %169 : vector<16x64xf32>
    %171 = arith.mulf %170, %160 : vector<16x64xf32>
    %cst_73 = arith.constant 0.254829586 : f32
    %172 = vector.broadcast %cst_73 : f32 to vector<16x64xf32>
    %173 = arith.addf %171, %172 : vector<16x64xf32>
    %174 = arith.mulf %173, %160 : vector<16x64xf32>
    %cst_74 = arith.constant 0.000000e+00 : f32
    %175 = vector.broadcast %cst_74 : f32 to vector<16x64xf32>
    %176 = arith.subf %175, %154 : vector<16x64xf32>
    %177 = arith.mulf %176, %154 : vector<16x64xf32>
    %178 = math.exp %177 : vector<16x64xf32>
    %179 = arith.mulf %174, %178 : vector<16x64xf32>
    %cst_75 = arith.constant 1.000000e+00 : f32
    %180 = vector.broadcast %cst_75 : f32 to vector<16x64xf32>
    %181 = arith.subf %180, %179 : vector<16x64xf32>
    %cst_76 = arith.constant 0.000000e+00 : f32
    %182 = vector.broadcast %cst_76 : f32 to vector<16x64xf32>
    %183 = arith.cmpf oge, %153, %182 : vector<16x64xf32>
    %cst_77 = arith.constant 0.000000e+00 : f32
    %184 = vector.broadcast %cst_77 : f32 to vector<16x64xf32>
    %185 = arith.subf %184, %181 : vector<16x64xf32>
    %186 = arith.select %183, %181, %185 : vector<16x64xi1>, vector<16x64xf32>
    %cst_78 = arith.constant 1.000000e+00 : f32
    %187 = vector.broadcast %cst_78 : f32 to vector<16x64xf32>
    %188 = arith.addf %187, %186 : vector<16x64xf32>
    %189 = arith.mulf %151, %188 : vector<16x64xf32>
    %190 = arith.truncf %189 : vector<16x64xf32> to vector<16x64xbf16>
    %c0_79 = arith.constant 0 : index
    %c0_80 = arith.constant 0 : index
    %c0_81 = arith.constant 0 : index
    %191 = vector.load %arg14[%c0_79, %c0_80, %c0_81] : memref<1x64x32xbf16, #tpu.memory_space<vmem>>, vector<1x64x32xbf16>
    %192 = vector.shape_cast %191 : vector<1x64x32xbf16> to vector<64x32xbf16>
    %cst_82 = arith.constant dense<0.000000e+00> : vector<16x32xf32>
    %193 = tpu.matmul %190, %192, %cst_82 {dimension_numbers = #tpu.dot_dimension_numbers<[1], [0], [0], [1], [0, 0, 1, 1], [], []>} : vector<16x64xbf16>, vector<64x32xbf16>, vector<16x32xf32> -> vector<16x32xf32>
    %c0_83 = arith.constant 0 : index
    %c0_84 = arith.constant 0 : index
    %c0_85 = arith.constant 0 : index
    %194 = vector.load %arg15[%c0_83, %c0_84, %c0_85] : memref<1x1x32xf32, #tpu.memory_space<vmem>>, vector<1x1x32xf32>
    %195 = vector.shape_cast %194 : vector<1x1x32xf32> to vector<1x32xf32>
    %196 = vector.broadcast %195 : vector<1x32xf32> to vector<16x32xf32>
    %197 = arith.addf %193, %196 : vector<16x32xf32>
    %198 = arith.addf %197, %141 : vector<16x32xf32>
    %c0_86 = arith.constant 0 : index
    %c0_87 = arith.constant 0 : index
    %c0_88 = arith.constant 0 : index
    %199 = vector.load %arg16[%c0_86, %c0_87, %c0_88] : memref<1x1x32xf32, #tpu.memory_space<vmem>>, vector<1x1x32xf32>
    %200 = vector.shape_cast %199 : vector<1x1x32xf32> to vector<1x32xf32>
    %c0_89 = arith.constant 0 : index
    %c0_90 = arith.constant 0 : index
    %c0_91 = arith.constant 0 : index
    %201 = vector.load %arg17[%c0_89, %c0_90, %c0_91] : memref<1x1x32xf32, #tpu.memory_space<vmem>>, vector<1x1x32xf32>
    %202 = vector.shape_cast %201 : vector<1x1x32xf32> to vector<1x32xf32>
    %cst_92 = arith.constant dense<0.000000e+00> : vector<16xf32>
    %203 = vector.multi_reduction <add>, %198, %cst_92 [1] : vector<16x32xf32> to vector<16xf32>
    %204 = vector.shape_cast %203 : vector<16xf32> to vector<16x1xf32>
    %cst_93 = arith.constant 3.200000e+01 : f32
    %205 = vector.broadcast %cst_93 : f32 to vector<16x1xf32>
    %206 = arith.divf %204, %205 : vector<16x1xf32>
    %207 = vector.broadcast %206 : vector<16x1xf32> to vector<16x32xf32>
    %208 = arith.subf %198, %207 : vector<16x32xf32>
    %209 = arith.mulf %208, %208 : vector<16x32xf32>
    %cst_94 = arith.constant dense<0.000000e+00> : vector<16xf32>
    %210 = vector.multi_reduction <add>, %209, %cst_94 [1] : vector<16x32xf32> to vector<16xf32>
    %211 = vector.shape_cast %210 : vector<16xf32> to vector<16x1xf32>
    %cst_95 = arith.constant 3.200000e+01 : f32
    %212 = vector.broadcast %cst_95 : f32 to vector<16x1xf32>
    %213 = arith.divf %211, %212 : vector<16x1xf32>
    %cst_96 = arith.constant 9.99999996E-13 : f32
    %214 = vector.broadcast %cst_96 : f32 to vector<16x1xf32>
    %215 = arith.addf %213, %214 : vector<16x1xf32>
    %216 = math.rsqrt %215 : vector<16x1xf32>
    %217 = vector.broadcast %216 : vector<16x1xf32> to vector<16x32xf32>
    %218 = arith.mulf %208, %217 : vector<16x32xf32>
    %219 = vector.broadcast %200 : vector<1x32xf32> to vector<16x32xf32>
    %220 = arith.mulf %218, %219 : vector<16x32xf32>
    %221 = vector.broadcast %202 : vector<1x32xf32> to vector<16x32xf32>
    %222 = arith.addf %220, %221 : vector<16x32xf32>
    %c0_97 = arith.constant 0 : index
    %c0_98 = arith.constant 0 : index
    %223 = vector.load %arg18[%c0_97, %c0_98] : memref<16x32xf32, #tpu.memory_space<vmem>>, vector<16x32xf32>
    tpu.vector_store %arg18[%c0_97, %c0_98], %222 {strides = array<i32>} : memref<16x32xf32, #tpu.memory_space<vmem>>, vector<16x32xf32>,
    return
  }
  func.func @transform_0(%arg0: i32, %arg1: i32) -> (i32, i32) {
    %c0_i32 = arith.constant 0 : i32
    %c0_i32_0 = arith.constant 0 : i32
    return %arg0, %c0_i32 : i32, i32
  }
  func.func @transform_1(%arg0: i32, %arg1: i32) -> (i32, i32, i32) {
    %c0_i32 = arith.constant 0 : i32
    %c0_i32_0 = arith.constant 0 : i32
    %c0_i32_1 = arith.constant 0 : i32
    return %arg0, %c0_i32, %c0_i32_0 : i32, i32, i32
  }
  func.func @transform_2(%arg0: i32, %arg1: i32) -> (i32, i32) {
    %c0_i32 = arith.constant 0 : i32
    %c0_i32_0 = arith.constant 0 : i32
    %c0_i32_1 = arith.constant 0 : i32
    return %c0_i32, %c0_i32_0 : i32, i32
  }
  func.func @transform_3(%arg0: i32, %arg1: i32) -> (i32, i32) {
    %c0_i32 = arith.constant 0 : i32
    %c0_i32_0 = arith.constant 0 : i32
    %c0_i32_1 = arith.constant 0 : i32
    return %c0_i32, %c0_i32_0 : i32, i32
  }
  func.func @transform_4(%arg0: i32, %arg1: i32) -> (i32, i32, i32) {
    %c0_i32 = arith.constant 0 : i32
    %c0_i32_0 = arith.constant 0 : i32
    %c0_i32_1 = arith.constant 0 : i32
    return %arg1, %c0_i32, %c0_i32_0 : i32, i32, i32
  }
  func.func @transform_5(%arg0: i32, %arg1: i32) -> (i32, i32, i32) {
    %c0_i32 = arith.constant 0 : i32
    %c0_i32_0 = arith.constant 0 : i32
    %c0_i32_1 = arith.constant 0 : i32
    return %arg1, %c0_i32, %c0_i32_0 : i32, i32, i32
  }
  func.func @transform_6(%arg0: i32, %arg1: i32) -> (i32, i32, i32) {
    %c0_i32 = arith.constant 0 : i32
    %c0_i32_0 = arith.constant 0 : i32
    %c0_i32_1 = arith.constant 0 : i32
    return %arg1, %c0_i32, %c0_i32_0 : i32, i32, i32
  }
  func.func @transform_7(%arg0: i32, %arg1: i32) -> (i32, i32, i32) {
    %c0_i32 = arith.constant 0 : i32
    %c0_i32_0 = arith.constant 0 : i32
    %c0_i32_1 = arith.constant 0 : i32
    return %arg1, %c0_i32, %c0_i32_0 : i32, i32, i32
  }
  func.func @transform_8(%arg0: i32, %arg1: i32) -> (i32, i32, i32) {
    %c0_i32 = arith.constant 0 : i32
    %c0_i32_0 = arith.constant 0 : i32
    %c0_i32_1 = arith.constant 0 : i32
    return %arg1, %c0_i32, %c0_i32_0 : i32, i32, i32
  }
  func.func @transform_9(%arg0: i32, %arg1: i32) -> (i32, i32, i32) {
    %c0_i32 = arith.constant 0 : i32
    %c0_i32_0 = arith.constant 0 : i32
    %c0_i32_1 = arith.constant 0 : i32
    return %arg1, %c0_i32, %c0_i32_0 : i32, i32, i32
  }
  func.func @transform_10(%arg0: i32, %arg1: i32) -> (i32, i32, i32) {
    %c0_i32 = arith.constant 0 : i32
    %c0_i32_0 = arith.constant 0 : i32
    %c0_i32_1 = arith.constant 0 : i32
    return %arg1, %c0_i32, %c0_i32_0 : i32, i32, i32
  }
  func.func @transform_11(%arg0: i32, %arg1: i32) -> (i32, i32, i32) {
    %c0_i32 = arith.constant 0 : i32
    %c0_i32_0 = arith.constant 0 : i32
    %c0_i32_1 = arith.constant 0 : i32
    return %arg1, %c0_i32, %c0_i32_0 : i32, i32, i32
  }
  func.func @transform_12(%arg0: i32, %arg1: i32) -> (i32, i32, i32) {
    %c0_i32 = arith.constant 0 : i32
    %c0_i32_0 = arith.constant 0 : i32
    %c0_i32_1 = arith.constant 0 : i32
    return %arg1, %c0_i32, %c0_i32_0 : i32, i32, i32
  }
  func.func @transform_13(%arg0: i32, %arg1: i32) -> (i32, i32, i32) {
    %c0_i32 = arith.constant 0 : i32
    %c0_i32_0 = arith.constant 0 : i32
    %c0_i32_1 = arith.constant 0 : i32
    return %arg1, %c0_i32, %c0_i32_0 : i32, i32, i32
  }
  func.func @transform_14(%arg0: i32, %arg1: i32) -> (i32, i32, i32) {
    %c0_i32 = arith.constant 0 : i32
    %c0_i32_0 = arith.constant 0 : i32
    %c0_i32_1 = arith.constant 0 : i32
    return %arg1, %c0_i32, %c0_i32_0 : i32, i32, i32
  }
  func.func @transform_15(%arg0: i32, %arg1: i32) -> (i32, i32, i32) {
    %c0_i32 = arith.constant 0 : i32
    %c0_i32_0 = arith.constant 0 : i32
    %c0_i32_1 = arith.constant 0 : i32
    return %arg1, %c0_i32, %c0_i32_0 : i32, i32, i32
  }
  func.func @transform_16(%arg0: i32, %arg1: i32) -> (i32, i32) {
    %c0_i32 = arith.constant 0 : i32
    %c0_i32_0 = arith.constant 0 : i32
    return %arg0, %c0_i32 : i32, i32
  }
}

</mosaic_0001>

<bundles_post_ra>
// kernel: text_encoder_forward.1
= control target key start
LH: loop header
LB: loop body
LE: loop exit
PB: predicated region body
PF: predicated region fallthrough
CT: control target
= control target key end

     0   :  { %s2878_s21 = smov 0   ;;  %s2880_s22 = smov 0   ;;  %s3262_s0 = inlined_call_operand.vmem [shape: f32[32,32], index: 0, kind: input, shape index: {}]   ;;  %s3263_s1 = inlined_call_operand.vmem [shape: f32[4,1,8], index: 1, kind: input, shape index: {}]   ;;  %s3264_s2 = inlined_call_operand.vmem [shape: f32[1,32], index: 2, kind: input, shape index: {}]   ;;  %s3265_s3 = inlined_call_operand.vmem [shape: f32[1,32], index: 3, kind: input, shape index: {}]   ;;  %s3266_s4 = inlined_call_operand.vmem [shape: bf16[2,32,96], index: 4, kind: input, shape index: {}]   ;;  %s3267_s5 = inlined_call_operand.vmem [shape: f32[2,1,96], index: 5, kind: input, shape index: {}]   ;;  %s3268_s6 = inlined_call_operand.vmem [shape: bf16[2,32,32], index: 6, kind: input, shape index: {}]   ;;  %s3269_s7 = inlined_call_operand.vmem [shape: f32[2,1,32], index: 7, kind: input, shape index: {}]   ;;  %s3270_s8 = inlined_call_operand.vmem [shape: f32[2,1,32], index: 8, kind: input, shape index: {}]   ;;  %s3271_s9 = inlined_call_operand.vmem [shape: f32[2,1,32], index: 9, kind: input, shape index: {}]   ;;  %s3272_s10 = inlined_call_operand.vmem [shape: bf16[2,32,64], index: 10, kind: input, shape index: {}]   ;;  %s3273_s11 = inlined_call_operand.vmem [shape: f32[2,1,64], index: 11, kind: input, shape index: {}]   ;;  %s3274_s12 = inlined_call_operand.vmem [shape: bf16[2,64,32], index: 12, kind: input, shape index: {}]   ;;  %s3275_s13 = inlined_call_operand.vmem [shape: f32[2,1,32], index: 13, kind: input, shape index: {}]   ;;  %s3276_s14 = inlined_call_operand.vmem [shape: f32[2,1,32], index: 14, kind: input, shape index: {}]   ;;  %s3277_s15 = inlined_call_operand.vmem [shape: f32[2,1,32], index: 15, kind: input, shape index: {}]   ;;  %s3278_s16 = inlined_call_operand.vmem [shape: f32[32,32], index: 16, kind: output, shape index: {}]  }
   0x1   :  { %3284 = sst [smem:[#allocation10_spill]] %s3262_s0  ;;  %s2882_s23 = smov 0  }
   0x2   :  { %3285 = sst [smem:[#allocation11_spill]] %s3263_s1  ;;  %s2884_s24 = smov 0  }
   0x3   :  { %3286 = sst [smem:[#allocation12_spill]] %s3264_s2  ;;  %s2886_s25 = smov 0  }
   0x4   :  { %3287 = sst [smem:[#allocation13_spill]] %s3265_s3 }
   0x5   :  { %3288 = sst [smem:[#allocation14_spill]] %s3266_s4 }
   0x6   :  { %3289 = sst [smem:[#allocation15_spill]] %s3268_s6 }
   0x7   :  { %3290 = sst [smem:[#allocation16_spill]] %s3272_s10 }
   0x8   :  { %3291 = sst [smem:[#allocation17_spill]] %s3273_s11 }
   0x9   :  { %3292 = sst [smem:[#allocation18_spill]] %s3277_s15 }
   0xa   :  { %3293 = sst [smem:[#allocation19_spill]] %s3278_s16 }
   0xb LB: > { %3294 = sst [smem:[#allocation3_spill]] %s2759_s21  ;;  %s35_s26 = sadd.s32 1, %s2767_s23  ;;  %s2775_s25 = sphi %s2886_s25, %s26_s25   ;;  %s2771_s24 = sphi %s2884_s24, %s3324_s24   ;;  %s2767_s23 = sphi %s2882_s23, %s3323_s23   ;;  %s2763_s22 = sphi %s2880_s22, %s3322_s22   ;;  %s2759_s21 = sphi %s2878_s21, %s3321_s21  }
   0xc   : > { %3295 = sst [smem:[#allocation4_spill]] %s2767_s23  ;;  %s38_s27 = sadd.s32 1, %s2771_s24 }
   0xd   : > { %3296 = sst [smem:[#allocation5_spill]] %s2771_s24  ;;  %p36_p0 = scmp.ge.s32.totalorder %s35_s26, 2 }
   0xe   : > { %3297 = sst [smem:[#allocation6_spill]] %s2775_s25  ;;  %p2378_p1 = scmp.ge.s32.totalorder %s2775_s25, 1 }
   0xf   : > { %p589_p2 = scmp.lt.s32.totalorder %s2775_s25, 5  ;;  %s3326_s26 = smov (%p36_p0, %s35_s26), 0 }
  0x10   : > { %3298 = sst [smem:[#allocation7_spill]] %s3326_s26  ;;  %s3328_s27 = smov (!%p36_p0, %s38_s27), %s2771_s24 }
  0x11   : > { %p590_p3 = pnand %p2378_p1, %p589_p2  ;;  %p40_p4 = scmp.ge.s32.totalorder %s3328_s27, 2 }
  0x13   : > { %s3330_s27 = smov (%p40_p4, %s3328_s27), 0  ;;  %593 = sbr.rel (%p590_p3) target bundleno = 4344 (0x10f8), region = 84 }
  0x14   : > { %3299 = sst [smem:[#allocation8_spill]] %s3330_s27 }
  0x18   : > { %s2379_s28 = sshll.u32 %s2763_s22, 1  ;;  %p698_p5 = scmp.lt.s32.totalorder %s2759_s21, 1 }
  0x19   : > { %p688_p6 = scmp.lt.s32.totalorder %s2379_s28, 3  ;;  %s3300_s1 = sld [smem:[#allocation11_spill]] }
  0x1a   : > { %s2912_s29 = scalar_select %p698_p5, %s2759_s21, 1 }
  0x1b   : > { %s3332_s28 = smov (!%p688_p6, %s2379_s28), 3  ;;  %s3301_s23 = sld [smem:[#allocation10_spill]] }
  0x1c   : > { %s2437_s30 = sshll.u32 %s2912_s29, 4  ;;  %s2380_s19 = sshll.u32 %s3332_s28, 3 }
  0x1d   : > { %s3302_s4 = sld [smem:[#allocation14_spill]]  ;;  %s735_s20 = scalar_lea.vmem %s3275_s13, %s2912_s29 }
  0x1e   : > { %s3303_s6 = sld [smem:[#allocation15_spill]]  ;;  %s738_s2 = scalar_lea.vmem %s3276_s14, %s2912_s29 }
  0x1f   : > { %s2922_s27 = scalar_lea.vmem %s3300_s1, %s3332_s28  ;;  %s3305_s10 = sld [smem:[#allocation16_spill]] }
  0x20   : > { %s3307_s26 = sld [smem:[#allocation18_spill]] }
  0x21   : > { %s691_s25 = scalar_lea.vmem %s3301_s23, %s2380_s19  ;;  %s3309_s18 = sld [smem:[#allocation3_spill]] }
  0x23   : > { %s2930_s21 = scalar_lea.vmem %s3302_s4, %s2437_s30 }
  0x24   : > { %s2935_s0 = scalar_lea.vmem %s3303_s6, %s2437_s30  ;;  %s3308_s6 = sld [smem:[#allocation19_spill]] }
  0x25   : > { %3304 = sst [smem:[#allocation9_spill]] %s2935_s0  ;;  %s2952_s4 = scalar_lea.vmem %s3305_s10, %s2437_s30 }
  0x26   : > { %s2440_s0 = sshll.u32 %s2912_s29, 5  ;;  %s741_s10 = scalar_lea.vmem %s3307_s26, %s2912_s29 }
  0x27   : > { %s2966_s1 = scalar_lea.vmem %s3274_s12, %s2440_s0  ;;  %p2392_p7 = scmp.ne.s32.totalorder %s3309_s18, 0 }
  0x28   : > { %s3311_s17 = sld [smem:[#allocation13_spill]] (!%p2392_p7) }
  0x29   : > { %752 = sbr.rel (%p2392_p7) target bundleno = 360 (0x168), region = 88 }
  0x2a   : > { %s2979_s11 = scalar_lea.vmem %s3308_s6, %s2380_s19  ;;  %s3310_s19 = sld [smem:[#allocation12_spill]] (!%p2392_p7) }
  0x2e   : > { %v753_v0 = vld [vmem:[%s691_s25] sm:$0xff]  ;;  %vm757_vm0 = vcmask 261120   ;;  %v754_v1 = vld [vmem:[%s691_s25 + $0x8] sm:$0xff] }
  0x2f   : > { %v758_v2 = vsel %vm757_vm0, %v753_v0, 0.0  ;;  %v761_v3 = vsel %vm757_vm0, %v754_v1, 0.0  ;;  %v2394_v23 = vld [vmem:[%s3311_s17] ss:$0 sm:$0xff] }
  0x30   : > { %759 = vadd.xlane.f32.xlu0 %v758_v2  ;;  %v2393_v21 = vld [vmem:[%s3310_s19] ss:$0 sm:$0xff] }
  0x34   : > { %762 = vadd.xlane.f32.xlu0 %v761_v3 }
  0xb9   : > { %v760_v4 = vpop.xlane.xlu0 %759 }
  0xba   : > { %v765_v5 = vmul.f32 0.03125, %v760_v4 }
  0xbc   : > { %v767_v6 = vsub.f32 %v753_v0, %v765_v5 }
  0xbd   : > { %v763_v7 = vpop.xlane.xlu0 %762 }
  0xbe   : > { %v766_v8 = vmul.f32 0.03125, %v763_v7  ;;  %v769_v9 = vmul.f32 %v767_v6, %v767_v6 }
  0xc0   : > { %v768_v10 = vsub.f32 %v754_v1, %v766_v8  ;;  %v771_v11 = vsel %vm757_vm0, %v769_v9, 0.0 }
  0xc1   : > { %772 = vadd.xlane.f32.xlu1 %v771_v11 }
  0xc2   : > { %v770_v12 = vmul.f32 %v768_v10, %v768_v10 }
  0xc4   : > { %v774_v13 = vsel %vm757_vm0, %v770_v12, 0.0 }
  0xc5   : > { %775 = vadd.xlane.f32.xlu1 %v774_v13 }
 0x14a   : > { %v773_v14 = vpop.xlane.xlu1 %772 }
 0x14b   : > { %v777_v15 = vmul.f32 0.03125, %v773_v14 }
 0x14d   : > { %v779_v16 = vadd.f32 1e-12, %v777_v15 }
 0x14e   : > { %v776_v17 = vpop.xlane.xlu1 %775 }
 0x14f   : > { %2675 = vrsqrt.f32 %v779_v16  ;;  %v778_v18 = vmul.f32 0.03125, %v776_v17 }
 0x151   : > { %v780_v19 = vadd.f32 1e-12, %v778_v18 }
 0x153   : > { %2677 = vrsqrt.f32 %v780_v19 }
 0x15c   : > { %v2676_v20 = vpop.eup %2675 }
 0x15d   : > { %v783_v22 = vmul.f32 %v2676_v20, %v767_v6 }
 0x15f   : > { %v791_v24 = vmul.f32 %v2393_v21, %v783_v22 }
 0x160   : > { %v2678_v25 = vpop.eup %2677 }
 0x161   : > { %v799_v26 = vadd.f32 %v2394_v23, %v791_v24  ;;  %v784_v27 = vmul.f32 %v2678_v25, %v768_v10 }
 0x163   : > { %801 = vst.msk [vmem:[%s2979_s11] sm:$0xff] %vm757_vm0, %v799_v26  ;;  %v792_v28 = vmul.f32 %v2393_v21, %v784_v27 }
 0x165   : > { %v800_v29 = vadd.f32 %v2394_v23, %v792_v28 }
 0x167   : > { %802 = vst.msk [vmem:[%s2979_s11 + $0x8] sm:$0xff] %vm757_vm0, %v800_v29 }
 0x168 PF: > { %v2679_v30 = vld [vmem:[%s2930_s21 + $0x8] sm:$0xff]   ;;  %v2777_v31 = vmov 0.0   ;;  %v2680_v32 = vld [vmem:[%s2930_s21] sm:$0xff]   ;;  %vm2778_vm1 = vmmov 0   ;;  %vm831_vm2 = vcmask 261120   ;;  %s3312_s22 = scalar_lea.vmem %s3267_s5, %s2912_s29  ;;  %s2779_s24 = smov 96  }
 0x169   : > { %2487 = vmatprep.subr.bf16.mxu0 %v2777_v31  ;;  %2495 = vmatprep.subr.bf16.mxu1 %v2777_v31  ;;  %v2395_v36 = vld [vmem:[%s3312_s22] ss:$0 sm:$0xff]  ;;  %vm893_vm3 = vcmask 64512   ;;  %v3045_v53 = vld [vmem:[%s2922_s27 + $0x1] ss:$0 sm:$0xff]  ;;  %s2780_s23 = smov 64  }
 0x16a   : > { %2488 = vmatpush3.bf16.msra.mxu0 %v2679_v30  ;;  %2491 = vmatprep.mubr.msk.bf16.mxu0 %vm2778_vm1, %v2777_v31  ;;  %v3003_v33 = vld [vmem:[%s2979_s11] sm:$0xff]  ;;  %vm1018_vm4 = vcmask 1043456   ;;  %s2782_s30 = smov 120   ;;  %s2783_s3 = smov 56   ;;  %vm1340_vm5 = vcmask 130112   ;;  %vm1571_vm6 = vcmask 195712  }
 0x16b   : > { %2489 = vmatprep.subr.bf16.mxu0 %v2777_v31  ;;  %2497 = vmatprep.mubr.msk.bf16.mxu1 %vm2778_vm1, %v2777_v31  ;;  %v3041_v49 = vld [vmem:[%s2922_s27] ss:$0 sm:$0xff]  ;;  %s2781_s27 = smov 88   ;;  %s2784_s15 = smov 80   ;;  %vm1802_vm7 = vcmask 261312   ;;  %vm2084_vm10 = vcmask 523264  }
 0x16c   : > { %s2785_s16 = smov 112   ;;  %s2786_s18 = smov 48  }
 0x16d   : > { %s2787_s6 = smov 72   ;;  %s2788_s25 = smov 104  }
 0x16e   : > { %v3006_v34 = vld [vmem:[%s2979_s11 + $0x8] sm:$0xff]  ;;  %2490 = vmatpush3.bf16.msra.mxu0 %v2680_v32  ;;  %s2789_s19 = smov 40   ;;  %s2790_s0 = smov 8  }
 0x16f   : > { %v807_v35 = vpack.c.bf16 %v3006_v34, %v3003_v33  ;;  %2501 = vmatprep.subr.bf16.mxu0 %v2777_v31  ;;  %s2791_s26 = smov 16   ;;  %s3313_s17 = sld [smem:[#allocation9_spill]] }
 0x170   : > { %s2792_s21 = smov 24  }
 0x171   : > { %2492 = vmatmul.mubr.msk.bf16.vlgmr.msra.gmra.mxu0 %vm831_vm2, %v807_v35 }
 0x172   : > { %2503 = vmatprep.mubr.msk.bf16.mxu0 %vm2778_vm1, %v2777_v31 }
 0x231   : > { %v869_v37 = vpop.f32.mrf.mxu0 }
 0x232   : > { %v870_v38 = vadd.f32 %v2395_v36, %v869_v37 }
 0x233   : > { %v2493_v39 = vpop.f32.mrf.mxu0 }
 0x234   : > { %v3022_v40 = vpack.c.bf16 %v870_v38, %v870_v38 }
 0x235   : > { %v872_v41 = vpop.f32.mrf.mxu0 }
 0x236   : > { %v873_v42 = vadd.f32 %v2395_v36, %v872_v41  ;;  %891 = vrot.lane.b32.xlu0 %v3022_v40, %s2779_s24 }
 0x237   : > { %v2494_v43 = vpop.f32.mrf.mxu0 }
 0x238   : > { %v3025_v44 = vpack.c.bf16 %v873_v42, %v873_v42 }
 0x23a   : > { %941 = vrot.lane.b32.xlu0 %v3025_v44, %s2779_s24  ;;  %s3314_s24 = scalar_lea.vmem %s3269_s7, %s2912_s29 }
 0x2a8   : > { %v892_v45 = vpop.permute.xlu0 %891 }
 0x2a9   : > { %v898_v46 = vsel %vm893_vm3, %v892_v45, 0 }
 0x2aa   : > { %2496 = vmatpush3.bf16.xpose.msra.mxu1 %v898_v46 }
 0x2ab   : > { %2507 = vmatprep.subr.bf16.mxu1 %v2777_v31 }
 0x2ac   : > { %v942_v47 = vpop.permute.xlu0 %941 }
 0x2ad   : > { %v947_v48 = vsel %vm893_vm3, %v942_v47, 0 }
 0x2ae   : > { %2502 = vmatpush3.bf16.xpose.msra.mxu0 %v947_v48 }
 0x2af   : > { %2513 = vmatprep.subr.bf16.mxu0 %v2777_v31 }
 0x2b1   : > { %2498 = vmatmul.mubr.msk.bf16.vlgmr.msra.gmra.mxu1 %vm893_vm3, %v3022_v40 }
 0x2b2   : > { %2509 = vmatprep.mubr.msk.bf16.mxu1 %vm2778_vm1, %v2777_v31 }
 0x2b5   : > { %2504 = vmatmul.mubr.msk.bf16.vlgmr.msra.gmra.mxu0 %vm893_vm3, %v3025_v44 }
 0x2b6   : > { %2515 = vmatprep.mubr.msk.bf16.mxu0 %vm2778_vm1, %v2777_v31 }
 0x371   : > { %v934_v50 = vpop.f32.mrf.mxu1 }
 0x372   : > { %v935_v51 = vadd.f32 %v3041_v49, %v934_v50 }
 0x373   : > { %v2499_v52 = vpop.f32.mrf.mxu1 }
 0x374   : > { %v989_v54 = vsel %vm893_vm3, %v935_v51, -inf }
 0x375   : > { %990 = vmax.xlane.f32.xlu1 %v989_v54  ;;  %v937_v55 = vpop.f32.mrf.mxu1  ;;  %v983_v56 = vpop.f32.mrf.mxu0 }
 0x376   : > { %v984_v57 = vadd.f32 %v3045_v53, %v983_v56 }
 0x377   : > { %v2500_v58 = vpop.f32.mrf.mxu1  ;;  %v2505_v59 = vpop.f32.mrf.mxu0 }
 0x378   : > { %v992_v60 = vsel %vm893_vm3, %v984_v57, -inf }
 0x379   : > { %993 = vmax.xlane.f32.xlu1 %v992_v60  ;;  %v986_v61 = vpop.f32.mrf.mxu0 }
 0x37b   : > { %v2506_v62 = vpop.f32.mrf.mxu0 }
 0x38a   : > { %1013 = vrot.lane.b32.xlu1 %v3022_v40, %s2780_s23 }
 0x38e   : > { %1062 = vrot.lane.b32.xlu1 %v3025_v44, %s2780_s23 }
 0x392   : > { %1114 = vrot.lane.b32.xlu1 %v3022_v40, %s2781_s27 }
 0x3fe   : > { %v991_v63 = vpop.xlane.xlu1 %990 }
 0x3ff   : > { %v995_v0 = vsub.f32 %v935_v51, %v991_v63 }
 0x401   : > { %v997_v1 = vmul.f32 1.442695, %v995_v0 }
 0x402   : > { %v994_v2 = vpop.xlane.xlu1 %993 }
 0x403   : > { %2689 = vpow2.f32 %v997_v1  ;;  %v996_v3 = vsub.f32 %v984_v57, %v994_v2 }
 0x405   : > { %v999_v4 = vmul.f32 1.442695, %v996_v3 }
 0x406   : > { %v1014_v5 = vpop.permute.xlu1 %1013 }
 0x407   : > { %2691 = vpow2.f32 %v999_v4  ;;  %v1020_v6 = vsel %vm1018_vm4, %v1014_v5, 0 }
 0x408   : > { %2508 = vmatpush3.bf16.msra.mxu1 %v1020_v6 }
 0x409   : > { %2519 = vmatprep.subr.bf16.mxu1 %v2777_v31 }
 0x40a   : > { %v1063_v7 = vpop.permute.xlu1 %1062 }
 0x40b   : > { %v1068_v8 = vsel %vm1018_vm4, %v1063_v7, 0 }
 0x40c   : > { %2514 = vmatpush3.bf16.msra.mxu0 %v1068_v8 }
 0x40d   : > { %2525 = vmatprep.subr.bf16.mxu0 %v2777_v31 }
 0x40e   : > { %v1115_v13 = vpop.permute.xlu1 %1114 }
 0x40f   : > { %v1120_v20 = vsel %vm893_vm3, %v1115_v13, 0 }
 0x410   : > { %v2690_v9 = vpop.eup %2689 }
 0x411   : > { %v1001_v10 = vsel %vm893_vm3, %v2690_v9, 0.0 }
 0x412   : > { %1002 = vadd.xlane.f32.xlu0 %v1001_v10 }
 0x414   : > { %v2692_v11 = vpop.eup %2691 }
 0x415   : > { %v1004_v12 = vsel %vm893_vm3, %v2692_v11, 0.0 }
 0x416   : > { %1005 = vadd.xlane.f32.xlu1 %v1004_v12 }
 0x427   : > { %1164 = vrot.lane.b32.xlu1 %v3025_v44, %s2781_s27 }
 0x428   : > { %1112 = vrot.lane.b32.xlu0 %v3022_v40, %s2782_s30 }
 0x42b   : > { %1162 = vrot.lane.b32.xlu1 %v3025_v44, %s2782_s30 }
 0x49b   : > { %v1003_v14 = vpop.xlane.xlu0 %1002 }
 0x49c   : > { %2693 = vrcp.f32 %v1003_v14 }
 0x49f   : > { %v1006_v15 = vpop.xlane.xlu1 %1005  ;;  %v1113_v25 = vpop.permute.xlu0 %1112 }
 0x4a0   : > { %2695 = vrcp.f32 %v1006_v15 }
 0x4a3   : > { %v1165_v22 = vpop.permute.xlu1 %1164 }
 0x4a4   : > { %v1170_v24 = vsel %vm893_vm3, %v1165_v22, 0 }
 0x4a7   : > { %v1163_v26 = vpop.permute.xlu1 %1162 }
 0x4a9   : > { %v2694_v16 = vpop.eup %2693 }
 0x4aa   : > { %v1009_v17 = vmul.f32 %v2694_v16, %v2690_v9 }
 0x4ac   : > { %v1011_v18 = vpack.c.bf16 %v1009_v17, %v1009_v17 }
 0x4ad   : > { %v2696_v19 = vpop.eup %2695 }
 0x4ae   : > { %2510 = vmatmul.mubr.msk.bf16.vlgmr.msra.gmra.mxu1 %vm893_vm3, %v1011_v18  ;;  %v1010_v21 = vmul.f32 %v2696_v19, %v2692_v11 }
 0x4af   : > { %2520 = vmatpush3.bf16.xpose.msra.mxu1 %v1120_v20  ;;  %2521 = vmatprep.mubr.msk.bf16.mxu1 %vm2778_vm1, %v2777_v31 }
 0x4b0   : > { %v1012_v23 = vpack.c.bf16 %v1010_v21, %v1010_v21  ;;  %2531 = vmatprep.subr.bf16.mxu1 %v2777_v31 }
 0x4b2   : > { %2516 = vmatmul.mubr.msk.bf16.vlgmr.msra.gmra.mxu0 %vm893_vm3, %v1012_v23 }
 0x4b3   : > { %2526 = vmatpush3.bf16.xpose.msra.mxu0 %v1170_v24  ;;  %2527 = vmatprep.mubr.msk.bf16.mxu0 %vm2778_vm1, %v2777_v31 }
 0x4b4   : > { %2537 = vmatprep.subr.bf16.mxu0 %v2777_v31 }
 0x4b6   : > { %2522 = vmatmul.mubr.msk.bf16.vlgmr.msra.gmra.mxu1 %vm893_vm3, %v1113_v25 }
 0x4b7   : > { %2533 = vmatprep.mubr.msk.bf16.mxu1 %vm2778_vm1, %v2777_v31 }
 0x4ba   : > { %2528 = vmatmul.mubr.msk.bf16.vlgmr.msra.gmra.mxu0 %vm893_vm3, %v1163_v26 }
 0x4bb   : > { %2539 = vmatprep.mubr.msk.bf16.mxu0 %vm2778_vm1, %v2777_v31 }
 0x56e   : > { %v1056_v27 = vpop.f32.mrf.mxu1 }
 0x56f   : > { %1110 = vst.msk [vmem:[#allocation2] sm:$0xff] %vm893_vm3, %v1056_v27 }
 0x570   : > { %v2511_v28 = vpop.f32.mrf.mxu1 }
 0x572   : > { %v1059_v29 = vpop.f32.mrf.mxu1  ;;  %v1104_v30 = vpop.f32.mrf.mxu0 }
 0x573   : > { %1111 = vst.msk [vmem:[#allocation2 + $0x8] sm:$0xff] %vm893_vm3, %v1104_v30 }
 0x574   : > { %v2512_v32 = vpop.f32.mrf.mxu1  ;;  %v2517_v35 = vpop.f32.mrf.mxu0 }
 0x576   : > { %v1107_v36 = vpop.f32.mrf.mxu0  ;;  %v1156_v37 = vpop.f32.mrf.mxu1 }
 0x577   : > { %v1157_v38 = vadd.f32 %v3041_v49, %v1156_v37 }
 0x578   : > { %v2518_v39 = vpop.f32.mrf.mxu0  ;;  %v2523_v41 = vpop.f32.mrf.mxu1 }
 0x579   : > { %v1212_v42 = vsel %vm893_vm3, %v1157_v38, -inf }
 0x57a   : > { %1213 = vmax.xlane.f32.xlu1 %v1212_v42  ;;  %v1159_v43 = vpop.f32.mrf.mxu1  ;;  %v1206_v45 = vpop.f32.mrf.mxu0 }
 0x57b   : > { %v1207_v46 = vadd.f32 %v3045_v53, %v1206_v45 }
 0x57c   : > { %v2524_v47 = vpop.f32.mrf.mxu1  ;;  %v2529_v48 = vpop.f32.mrf.mxu0 }
 0x57d   : > { %v1215_v50 = vsel %vm893_vm3, %v1207_v46, -inf }
 0x57e   : > { %1216 = vmax.xlane.f32.xlu0 %v1215_v50  ;;  %v1209_v51 = vpop.f32.mrf.mxu0 }
 0x580   : > { %v2530_v52 = vpop.f32.mrf.mxu0 }
 0x58b   : > { %1236 = vrot.lane.b32.xlu1 %v3022_v40, %s2783_s3 }
 0x58f   : > { %1345 = vrot.lane.b32.xlu1 %v3022_v40, %s2784_s15 }
 0x594   : > { %1284 = vrot.lane.b32.xlu0 %v3025_v44, %s2783_s3 }
 0x598   : > { %1343 = vrot.lane.b32.xlu0 %v3022_v40, %s2785_s16 }
 0x603   : > { %v1214_v54 = vpop.xlane.xlu1 %1213 }
 0x604   : > { %v1218_v55 = vsub.f32 %v1157_v38, %v1214_v54 }
 0x606   : > { %v1220_v56 = vmul.f32 1.442695, %v1218_v55 }
 0x607   : > { %v1237_v57 = vpop.permute.xlu1 %1236  ;;  %v1217_v58 = vpop.xlane.xlu0 %1216 }
 0x608   : > { %2697 = vpow2.f32 %v1220_v56  ;;  %v1242_v59 = vsel %vm1018_vm4, %v1237_v57, 0  ;;  %v1219_v60 = vsub.f32 %v1207_v46, %v1217_v58 }
 0x609   : > { %2532 = vmatpush3.bf16.msra.mxu1 %v1242_v59 }
 0x60a   : > { %v1222_v61 = vmul.f32 1.442695, %v1219_v60  ;;  %2543 = vmatprep.subr.bf16.mxu1 %v2777_v31 }
 0x60b   : > { %v1285_v62 = vpop.permute.xlu0 %1284  ;;  %v1346_v4 = vpop.permute.xlu1 %1345 }
 0x60c   : > { %2699 = vpow2.f32 %v1222_v61  ;;  %v1290_v63 = vsel %vm1018_vm4, %v1285_v62, 0  ;;  %v1351_v11 = vsel %vm893_vm3, %v1346_v4, 0 }
 0x60d   : > { %2538 = vmatpush3.bf16.msra.mxu0 %v1290_v63 }
 0x60e   : > { %2549 = vmatprep.subr.bf16.mxu0 %v2777_v31 }
 0x60f   : > { %v1344_v16 = vpop.permute.xlu0 %1343 }
 0x615   : > { %v2698_v0 = vpop.eup %2697 }
 0x616   : > { %v1224_v1 = vsel %vm893_vm3, %v2698_v0, 0.0 }
 0x617   : > { %1225 = vadd.xlane.f32.xlu1 %v1224_v1 }
 0x619   : > { %v2700_v2 = vpop.eup %2699 }
 0x61a   : > { %v1227_v3 = vsel %vm893_vm3, %v2700_v2, 0.0 }
 0x61b   : > { %1228 = vadd.xlane.f32.xlu1 %v1227_v3 }
 0x62c   : > { %1395 = vrot.lane.b32.xlu1 %v3025_v44, %s2784_s15  ;;  %s3316_s15 = scalar_lea.vmem %s3271_s9, %s2912_s29 }
 0x630   : > { %1393 = vrot.lane.b32.xlu1 %v3025_v44, %s2785_s16 }
 0x6a0   : > { %v1226_v5 = vpop.xlane.xlu1 %1225 }
 0x6a1   : > { %2701 = vrcp.f32 %v1226_v5 }
 0x6a4   : > { %v1229_v6 = vpop.xlane.xlu1 %1228 }
 0x6a5   : > { %2703 = vrcp.f32 %v1229_v6 }
 0x6a8   : > { %v1396_v13 = vpop.permute.xlu1 %1395 }
 0x6a9   : > { %v1401_v15 = vsel %vm893_vm3, %v1396_v13, 0 }
 0x6ac   : > { %v1394_v17 = vpop.permute.xlu1 %1393 }
 0x6ae   : > { %v2702_v7 = vpop.eup %2701 }
 0x6af   : > { %v1232_v8 = vmul.f32 %v2702_v7, %v2698_v0 }
 0x6b1   : > { %v1234_v9 = vpack.c.bf16 %v1232_v8, %v1232_v8 }
 0x6b2   : > { %v2704_v10 = vpop.eup %2703 }
 0x6b3   : > { %2534 = vmatmul.mubr.msk.bf16.vlgmr.msra.gmra.mxu1 %vm893_vm3, %v1234_v9  ;;  %v1233_v12 = vmul.f32 %v2704_v10, %v2700_v2 }
 0x6b4   : > { %2544 = vmatpush3.bf16.xpose.msra.mxu1 %v1351_v11  ;;  %2545 = vmatprep.mubr.msk.bf16.mxu1 %vm2778_vm1, %v2777_v31 }
 0x6b5   : > { %v1235_v14 = vpack.c.bf16 %v1233_v12, %v1233_v12  ;;  %2555 = vmatprep.subr.bf16.mxu1 %v2777_v31 }
 0x6b7   : > { %2540 = vmatmul.mubr.msk.bf16.vlgmr.msra.gmra.mxu0 %vm893_vm3, %v1235_v14 }
 0x6b8   : > { %2550 = vmatpush3.bf16.xpose.msra.mxu0 %v1401_v15  ;;  %2551 = vmatprep.mubr.msk.bf16.mxu0 %vm2778_vm1, %v2777_v31 }
 0x6b9   : > { %2561 = vmatprep.subr.bf16.mxu0 %v2777_v31 }
 0x6bb   : > { %2546 = vmatmul.mubr.msk.bf16.vlgmr.msra.gmra.mxu1 %vm893_vm3, %v1344_v16 }
 0x6bc   : > { %2557 = vmatprep.mubr.msk.bf16.mxu1 %vm2778_vm1, %v2777_v31 }
 0x6bf   : > { %2552 = vmatmul.mubr.msk.bf16.vlgmr.msra.gmra.mxu0 %vm893_vm3, %v1394_v17 }
 0x6c0   : > { %2563 = vmatprep.mubr.msk.bf16.mxu0 %vm2778_vm1, %v2777_v31 }
 0x773   : > { %v3112_v18 = vpop.f32.mrf.mxu1 }
 0x775   : > { %v2535_v19 = vpop.f32.mrf.mxu1 }
 0x777   : > { %v1281_v20 = vpop.f32.mrf.mxu1  ;;  %v3114_v21 = vpop.f32.mrf.mxu0 }
 0x779   : > { %v2536_v22 = vpop.f32.mrf.mxu1  ;;  %v2541_v23 = vpop.f32.mrf.mxu0 }
 0x77b   : > { %v1329_v24 = vpop.f32.mrf.mxu0  ;;  %v1387_v25 = vpop.f32.mrf.mxu1 }
 0x77c   : > { %v1388_v26 = vadd.f32 %v3041_v49, %v1387_v25 }
 0x77d   : > { %v2542_v27 = vpop.f32.mrf.mxu0  ;;  %v2547_v28 = vpop.f32.mrf.mxu1 }
 0x77e   : > { %v1443_v29 = vsel %vm893_vm3, %v1388_v26, -inf }
 0x77f   : > { %1444 = vmax.xlane.f32.xlu0 %v1443_v29  ;;  %v1390_v30 = vpop.f32.mrf.mxu1  ;;  %v1437_v32 = vpop.f32.mrf.mxu0 }
 0x780   : > { %v1438_v35 = vadd.f32 %v3045_v53, %v1437_v32 }
 0x781   : > { %v2548_v36 = vpop.f32.mrf.mxu1  ;;  %v2553_v37 = vpop.f32.mrf.mxu0 }
 0x782   : > { %v1446_v38 = vsel %vm893_vm3, %v1438_v35, -inf }
 0x783   : > { %1447 = vmax.xlane.f32.xlu1 %v1446_v38  ;;  %v1440_v39 = vpop.f32.mrf.mxu0 }
 0x785   : > { %v2554_v41 = vpop.f32.mrf.mxu0 }
 0x794   : > { %1467 = vrot.lane.b32.xlu1 %v3022_v40, %s2786_s18 }
 0x798   : > { %1576 = vrot.lane.b32.xlu1 %v3022_v40, %s2787_s6 }
 0x79c   : > { %1626 = vrot.lane.b32.xlu1 %v3025_v44, %s2787_s6  ;;  %s3317_s6 = sld [smem:[#allocation17_spill]] }
 0x7a0   : > { %1624 = vrot.lane.b32.xlu1 %v3025_v44, %s2788_s25 }
 0x808   : > { %v1445_v42 = vpop.xlane.xlu0 %1444 }
 0x809   : > { %v1449_v43 = vsub.f32 %v1388_v26, %v1445_v42 }
 0x80b   : > { %v1451_v45 = vmul.f32 1.442695, %v1449_v43 }
 0x80c   : > { %v1448_v46 = vpop.xlane.xlu1 %1447 }
 0x80d   : > { %2705 = vpow2.f32 %v1451_v45  ;;  %v1450_v47 = vsub.f32 %v1438_v35, %v1448_v46 }
 0x80f   : > { %v1453_v48 = vmul.f32 1.442695, %v1450_v47 }
 0x810   : > { %v1468_v50 = vpop.permute.xlu1 %1467 }
 0x811   : > { %2707 = vpow2.f32 %v1453_v48  ;;  %v1473_v51 = vsel %vm1018_vm4, %v1468_v50, 0 }
 0x812   : > { %2556 = vmatpush3.bf16.msra.mxu1 %v1473_v51 }
 0x813   : > { %2567 = vmatprep.subr.bf16.mxu1 %v2777_v31 }
 0x814   : > { %v1577_v62 = vpop.permute.xlu1 %1576 }
 0x815   : > { %v1582_v2 = vsel %vm893_vm3, %v1577_v62, 0 }
 0x818   : > { %v1627_v4 = vpop.permute.xlu1 %1626 }
 0x819   : > { %v1632_v6 = vsel %vm893_vm3, %v1627_v4, 0 }
 0x81a   : > { %v2706_v52 = vpop.eup %2705 }
 0x81b   : > { %v1455_v54 = vsel %vm893_vm3, %v2706_v52, 0.0 }
 0x81c   : > { %1456 = vadd.xlane.f32.xlu0 %v1455_v54  ;;  %v1625_v8 = vpop.permute.xlu1 %1624 }
 0x81e   : > { %v2708_v55 = vpop.eup %2707 }
 0x81f   : > { %v1458_v56 = vsel %vm893_vm3, %v2708_v55, 0.0 }
 0x820   : > { %1459 = vadd.xlane.f32.xlu0 %v1458_v56 }
 0x836   : > { %1515 = vrot.lane.b32.xlu0 %v3025_v44, %s2786_s18 }
 0x83a   : > { %1574 = vrot.lane.b32.xlu0 %v3022_v40, %s2788_s25  ;;  %s3318_s25 = scalar_lea.vmem %s3317_s6, %s2912_s29 }
 0x8a5   : > { %v1457_v57 = vpop.xlane.xlu0 %1456 }
 0x8a6   : > { %2709 = vrcp.f32 %v1457_v57 }
 0x8a9   : > { %v1460_v58 = vpop.xlane.xlu0 %1459 }
 0x8aa   : > { %2711 = vrcp.f32 %v1460_v58  ;;  %v2681_v58 = vld [vmem:[%s3313_s17 + $0x8] sm:$0xff]  }
 0x8ad   : > { %v1516_v59 = vpop.permute.xlu0 %1515 }
 0x8ae   : > { %v1521_v60 = vsel %vm1018_vm4, %v1516_v59, 0  ;;  %v2682_v59 = vld [vmem:[%s3313_s17] sm:$0xff]  }
 0x8af   : > { %2562 = vmatpush3.bf16.msra.mxu0 %v1521_v60 }
 0x8b0   : > { %2573 = vmatprep.subr.bf16.mxu0 %v2777_v31 }
 0x8b1   : > { %v1575_v7 = vpop.permute.xlu0 %1574 }
 0x8b3   : > { %v2710_v61 = vpop.eup %2709 }
 0x8b4   : > { %v1463_v63 = vmul.f32 %v2710_v61, %v2706_v52 }
 0x8b6   : > { %v1465_v0 = vpack.c.bf16 %v1463_v63, %v1463_v63 }
 0x8b7   : > { %v2712_v1 = vpop.eup %2711 }
 0x8b8   : > { %2558 = vmatmul.mubr.msk.bf16.vlgmr.msra.gmra.mxu1 %vm893_vm3, %v1465_v0  ;;  %v1464_v3 = vmul.f32 %v2712_v1, %v2708_v55 }
 0x8b9   : > { %2568 = vmatpush3.bf16.xpose.msra.mxu1 %v1582_v2  ;;  %2569 = vmatprep.mubr.msk.bf16.mxu1 %vm2778_vm1, %v2777_v31 }
 0x8ba   : > { %v1466_v5 = vpack.c.bf16 %v1464_v3, %v1464_v3  ;;  %2579 = vmatprep.subr.bf16.mxu1 %v2777_v31 }
 0x8bc   : > { %2564 = vmatmul.mubr.msk.bf16.vlgmr.msra.gmra.mxu0 %vm893_vm3, %v1466_v5 }
 0x8bd   : > { %2574 = vmatpush3.bf16.xpose.msra.mxu0 %v1632_v6  ;;  %2575 = vmatprep.mubr.msk.bf16.mxu0 %vm2778_vm1, %v2777_v31 }
 0x8be   : > { %2585 = vmatprep.subr.bf16.mxu0 %v2777_v31 }
 0x8c0   : > { %2570 = vmatmul.mubr.msk.bf16.vlgmr.msra.gmra.mxu1 %vm893_vm3, %v1575_v7 }
 0x8c1   : > { %2581 = vmatprep.mubr.msk.bf16.mxu1 %vm2778_vm1, %v2777_v31 }
 0x8c4   : > { %2576 = vmatmul.mubr.msk.bf16.vlgmr.msra.gmra.mxu0 %vm893_vm3, %v1625_v8 }
 0x8c5   : > { %2587 = vmatprep.mubr.msk.bf16.mxu0 %vm2778_vm1, %v2777_v31 }
 0x978   : > { %v1509_v9 = vpop.f32.mrf.mxu1 }
 0x97a   : > { %v2559_v10 = vpop.f32.mrf.mxu1 }
 0x97c   : > { %v1512_v11 = vpop.f32.mrf.mxu1  ;;  %v1557_v12 = vpop.f32.mrf.mxu0 }
 0x97e   : > { %v2560_v13 = vpop.f32.mrf.mxu1  ;;  %v2565_v14 = vpop.f32.mrf.mxu0 }
 0x980   : > { %v1560_v15 = vpop.f32.mrf.mxu0  ;;  %v1618_v16 = vpop.f32.mrf.mxu1 }
 0x981   : > { %v1619_v17 = vadd.f32 %v3041_v49, %v1618_v16 }
 0x982   : > { %v2566_v19 = vpop.f32.mrf.mxu0  ;;  %v2571_v20 = vpop.f32.mrf.mxu1 }
 0x983   : > { %v1674_v22 = vsel %vm893_vm3, %v1619_v17, -inf }
 0x984   : > { %1675 = vmax.xlane.f32.xlu0 %v1674_v22  ;;  %v1621_v23 = vpop.f32.mrf.mxu1  ;;  %v1668_v24 = vpop.f32.mrf.mxu0 }
 0x985   : > { %v1669_v25 = vadd.f32 %v3045_v53, %v1668_v24 }
 0x986   : > { %v2572_v26 = vpop.f32.mrf.mxu1  ;;  %v2577_v27 = vpop.f32.mrf.mxu0 }
 0x987   : > { %v1677_v28 = vsel %vm893_vm3, %v1669_v25, -inf }
 0x988   : > { %1678 = vmax.xlane.f32.xlu1 %v1677_v28  ;;  %v1671_v29 = vpop.f32.mrf.mxu0 }
 0x98a   : > { %v2578_v30 = vpop.f32.mrf.mxu0 }
 0x999   : > { %1698 = vrot.lane.b32.xlu1 %v3022_v40, %s2789_s19 }
 0x99d   : > { %1334 = vrot.lane.b32.xlu1 %v3112_v18, %s2790_s0 }
 0x9a1   : > { %1336 = vrot.lane.b32.xlu1 %v3114_v21, %s2790_s0 }
 0x9a5   : > { %1567 = vrot.lane.b32.xlu1 %v1557_v12, %s2791_s26 }
 0xa0d   : > { %v1676_v49 = vpop.xlane.xlu0 %1675 }
 0xa0e   : > { %v1680_v53 = vsub.f32 %v1619_v17, %v1676_v49  ;;  %v2684_v49 = vld [vmem:[%s2952_s4] sm:$0xff]  }
 0xa10   : > { %v1682_v32 = vmul.f32 1.442695, %v1680_v53 }
 0xa11   : > { %v1679_v35 = vpop.xlane.xlu1 %1678 }
 0xa12   : > { %2713 = vpow2.f32 %v1682_v32  ;;  %v1681_v36 = vsub.f32 %v1669_v25, %v1679_v35 }
 0xa14   : > { %v1684_v37 = vmul.f32 1.442695, %v1681_v36 }
 0xa15   : > { %v1699_v38 = vpop.permute.xlu1 %1698 }
 0xa16   : > { %2715 = vpow2.f32 %v1684_v37  ;;  %v1704_v39 = vsel %vm1018_vm4, %v1699_v38, 0 }
 0xa17   : > { %2580 = vmatpush3.bf16.msra.mxu1 %v1704_v39 }
 0xa18   : > { %2591 = vmatprep.subr.bf16.mxu1 %v2777_v31 }
 0xa19   : > { %v1335_v40 = vpop.permute.xlu1 %1334 }
 0xa1a   : > { %1341 = vst.msk [vmem:[#allocation2] sm:$0xff] %vm1340_vm5, %v1335_v40 }
 0xa1d   : > { %v1337_v18 = vpop.permute.xlu1 %1336 }
 0xa1e   : > { %1342 = vst.msk [vmem:[#allocation2 + $0x8] sm:$0xff] %vm1340_vm5, %v1337_v18 }
 0xa1f   : > { %v2714_v21 = vpop.eup %2713 }
 0xa20   : > { %v1686_v41 = vsel %vm893_vm3, %v2714_v21, 0.0 }
 0xa21   : > { %1687 = vadd.xlane.f32.xlu0 %v1686_v41  ;;  %v1568_v42 = vpop.permute.xlu1 %1567 }
 0xa22   : > { %1573 = vst.msk [vmem:[#allocation2 + $0x8] sm:$0xff] %vm1571_vm6, %v1568_v42 }
 0xa23   : > { %v2716_v43 = vpop.eup %2715 }
 0xa24   : > { %v1689_v45 = vsel %vm893_vm3, %v2716_v43, 0.0 }
 0xa25   : > { %1690 = vadd.xlane.f32.xlu0 %v1689_v45 }
 0xa3b   : > { %1746 = vrot.lane.b32.xlu0 %v3025_v44, %s2789_s19 }
 0xa3f   : > { %1565 = vrot.lane.b32.xlu0 %v1509_v9, %s2791_s26  ;;  %v2417_v9 = vld [vmem:[%s3314_s24] ss:$0 sm:$0xff] }
 0xaaa   : > { %v1688_v46 = vpop.xlane.xlu0 %1687 }
 0xaab   : > { %2717 = vrcp.f32 %v1688_v46 }
 0xaae   : > { %v1691_v47 = vpop.xlane.xlu0 %1690 }
 0xaaf   : > { %2719 = vrcp.f32 %v1691_v47 }
 0xab2   : > { %v1747_v48 = vpop.permute.xlu0 %1746 }
 0xab3   : > { %v1752_v50 = vsel %vm1018_vm4, %v1747_v48, 0 }
 0xab4   : > { %2586 = vmatpush3.bf16.msra.mxu0 %v1752_v50  ;;  %v2685_v50 = vld [vmem:[%s2966_s1 + $0x18] sm:$0xff]  }
 0xab5   : > { %2599 = vmatprep.subr.bf16.mxu0 %v2777_v31 }
 0xab6   : > { %v1566_v51 = vpop.permute.xlu0 %1565 }
 0xab7   : > { %1572 = vst.msk [vmem:[#allocation2] sm:$0xff] %vm1571_vm6, %v1566_v51  ;;  %v2686_v51 = vld [vmem:[%s2966_s1 + $0x10] sm:$0xff]  }
 0xab8   : > { %v2718_v52 = vpop.eup %2717 }
 0xab9   : > { %v1694_v54 = vmul.f32 %v2718_v52, %v2714_v21  ;;  %v2687_v52 = vld [vmem:[%s2966_s1 + $0x8] sm:$0xff]  }
 0xabb   : > { %v1696_v55 = vpack.c.bf16 %v1694_v54, %v1694_v54  ;;  %v2688_v54 = vld [vmem:[%s2966_s1] sm:$0xff]  }
 0xabc   : > { %v2720_v44 = vpop.eup %2719 }
 0xabd   : > { %2582 = vmatmul.mubr.msk.bf16.vlgmr.msra.gmra.mxu1 %vm893_vm3, %v1696_v55  ;;  %v1695_v56 = vmul.f32 %v2720_v44, %v2716_v43  ;;  %v2422_v43 = vld [vmem:[%s3316_s15] ss:$0 sm:$0xff] }
 0xabe   : > { %2595 = vmatprep.mubr.msk.bf16.mxu1 %vm2778_vm1, %v2777_v31  ;;  %2592 = vmatpush3.bf16.msra.mxu1 %v2681_v58  ;;  %v2423_v55 = vld [vmem:[%s3318_s25] ss:$0 sm:$0xff] }
 0xabf   : > { %v1697_v57 = vpack.c.bf16 %v1695_v56, %v1695_v56  ;;  %2593 = vmatprep.subr.bf16.mxu1 %v2777_v31 }
 0xac1   : > { %2588 = vmatmul.mubr.msk.bf16.vlgmr.msra.gmra.mxu0 %vm893_vm3, %v1697_v57 }
 0xac2   : > { %2603 = vmatprep.mubr.msk.bf16.mxu0 %vm2778_vm1, %v2777_v31  ;;  %2594 = vmatpush3.bf16.msra.mxu1 %v2682_v59 }
 0xac3   : > { %2607 = vmatprep.subr.bf16.mxu1 %v2777_v31 }
 0xb7d   : > { %v1740_v60 = vpop.f32.mrf.mxu1 }
 0xb7e   : > { %1796 = vrot.lane.b32.xlu0 %v1740_v60, %s2792_s21 }
 0xb7f   : > { %v2583_v61 = vpop.f32.mrf.mxu1 }
 0xb81   : > { %v1743_v62 = vpop.f32.mrf.mxu1  ;;  %v1788_v63 = vpop.f32.mrf.mxu0 }
 0xb82   : > { %1798 = vrot.lane.b32.xlu1 %v1788_v63, %s2792_s21 }
 0xb83   : > { %v2584_v0 = vpop.f32.mrf.mxu1  ;;  %v2589_v1 = vpop.f32.mrf.mxu0 }
 0xb85   : > { %v1791_v2 = vpop.f32.mrf.mxu0 }
 0xb87   : > { %v2590_v3 = vpop.f32.mrf.mxu0 }
 0xbf0   : > { %v1797_v4 = vpop.permute.xlu0 %1796 }
 0xbf1   : > { %1803 = vst.msk [vmem:[#allocation2] sm:$0xff] %vm1802_vm7, %v1797_v4 }
 0xbf4   : > { %v1799_v5 = vpop.permute.xlu1 %1798 }
 0xbf5   : > { %1804 = vst.msk [vmem:[#allocation2 + $0x8] sm:$0xff] %vm1802_vm7, %v1799_v5 }
 0xbf8   : > { %v1805_v6 = vld [vmem:[#allocation2] sm:$0xff] }
 0xbfc   : > { %v1806_v7 = vld [vmem:[#allocation2 + $0x8] sm:$0xff] }
 0xbfd   : > { %v1807_v8 = vpack.c.bf16 %v1806_v7, %v1805_v6 }
 0xbff   : > { %2596 = vmatmul.mubr.msk.bf16.vlgmr.msra.gmra.mxu1 %vm831_vm2, %v1807_v8 }
 0xc00   : > { %2615 = vmatprep.mubr.msk.bf16.mxu1 %vm2778_vm1, %v2777_v31  ;;  %2608 = vmatpush3.bf16.msra.mxu1 %v2685_v50  ;;  %v2427_v50 = vld [vmem:[%s735_s20] ss:$0 sm:$0xff] }
 0xc01   : > { %2609 = vmatprep.subr.bf16.mxu1 %v2777_v31 }
 0xc04   : > { %2610 = vmatpush3.bf16.msra.mxu1 %v2686_v51 }
 0xc05   : > { %2611 = vmatprep.subr.bf16.mxu1 %v2777_v31 }
 0xc08   : > { %2612 = vmatpush3.bf16.msra.mxu1 %v2687_v52 }
 0xc09   : > { %2613 = vmatprep.subr.bf16.mxu1 %v2777_v31 }
 0xc0c   : > { %2614 = vmatpush3.bf16.msra.mxu1 %v2688_v54 }
 0xcbf   : > { %v1868_v10 = vpop.f32.mrf.mxu1 }
 0xcc0   : > { %v1869_v11 = vadd.f32 %v2417_v9, %v1868_v10 }
 0xcc1   : > { %v2597_v12 = vpop.f32.mrf.mxu1 }
 0xcc2   : > { %v1875_v13 = vadd.f32 %v1869_v11, %v3003_v33 }
 0xcc3   : > { %v1871_v14 = vpop.f32.mrf.mxu1 }
 0xcc4   : > { %v1872_v15 = vadd.f32 %v2417_v9, %v1871_v14  ;;  %v1879_v16 = vsel %vm831_vm2, %v1875_v13, 0.0 }
 0xcc5   : > { %1880 = vadd.xlane.f32.xlu0 %v1879_v16  ;;  %v2598_v17 = vpop.f32.mrf.mxu1 }
 0xcc6   : > { %v1876_v19 = vadd.f32 %v1872_v15, %v3006_v34  ;;  %v2683_v34 = vld [vmem:[%s2952_s4 + $0x8] sm:$0xff]   ;;  %s3315_s4 = scalar_lea.vmem %s3270_s8, %s2912_s29 }
 0xcc7   : > { %2600 = vmatpush3.bf16.msra.mxu0 %v2683_v34  ;;  %v2421_v18 = vld [vmem:[%s3315_s4] ss:$0 sm:$0xff] }
 0xcc8   : > { %v1882_v20 = vsel %vm831_vm2, %v1876_v19, 0.0  ;;  %2601 = vmatprep.subr.bf16.mxu0 %v2777_v31 }
 0xcc9   : > { %1883 = vadd.xlane.f32.xlu1 %v1882_v20 }
 0xccb   : > { %2602 = vmatpush3.bf16.msra.mxu0 %v2684_v49 }
 0xd4e   : > { %v1881_v22 = vpop.xlane.xlu0 %1880 }
 0xd4f   : > { %v1886_v23 = vmul.f32 0.03125, %v1881_v22 }
 0xd51   : > { %v1888_v24 = vsub.f32 %v1875_v13, %v1886_v23 }
 0xd52   : > { %v1884_v25 = vpop.xlane.xlu1 %1883 }
 0xd53   : > { %v1887_v26 = vmul.f32 0.03125, %v1884_v25  ;;  %v1890_v27 = vmul.f32 %v1888_v24, %v1888_v24 }
 0xd55   : > { %v1889_v33 = vsub.f32 %v1876_v19, %v1887_v26  ;;  %v1892_v28 = vsel %vm831_vm2, %v1890_v27, 0.0 }
 0xd56   : > { %1893 = vadd.xlane.f32.xlu0 %v1892_v28 }
 0xd57   : > { %v1891_v29 = vmul.f32 %v1889_v33, %v1889_v33 }
 0xd59   : > { %v1895_v30 = vsel %vm831_vm2, %v1891_v29, 0.0 }
 0xd5a   : > { %1896 = vadd.xlane.f32.xlu0 %v1895_v30 }
 0xddf   : > { %v1894_v53 = vpop.xlane.xlu0 %1893 }
 0xde0   : > { %v1898_v32 = vmul.f32 0.03125, %v1894_v53 }
 0xde2   : > { %v1900_v35 = vadd.f32 1e-12, %v1898_v32 }
 0xde3   : > { %v1897_v36 = vpop.xlane.xlu0 %1896 }
 0xde4   : > { %2721 = vrsqrt.f32 %v1900_v35  ;;  %v1899_v37 = vmul.f32 0.03125, %v1897_v36 }
 0xde6   : > { %v1901_v38 = vadd.f32 1e-12, %v1899_v37 }
 0xde8   : > { %2723 = vrsqrt.f32 %v1901_v38 }
 0xdf1   : > { %v2722_v39 = vpop.eup %2721 }
 0xdf2   : > { %v1904_v40 = vmul.f32 %v2722_v39, %v1888_v24 }
 0xdf4   : > { %v1912_v42 = vmul.f32 %v2421_v18, %v1904_v40 }
 0xdf5   : > { %v2724_v21 = vpop.eup %2723 }
 0xdf6   : > { %v1905_v41 = vmul.f32 %v2724_v21, %v1889_v33  ;;  %v3203_v46 = vadd.f32 %v2422_v43, %v1912_v42 }
 0xdf8   : > { %v1913_v45 = vmul.f32 %v2421_v18, %v1905_v41 }
 0xdfa   : > { %v3205_v47 = vadd.f32 %v2422_v43, %v1913_v45 }
 0xdfc   : > { %v1922_v48 = vpack.c.bf16 %v3205_v47, %v3203_v46 }
 0xdfe   : > { %2604 = vmatmul.mubr.msk.bf16.vlgmr.msra.gmra.mxu0 %vm831_vm2, %v1922_v48 }
 0xebe   : > { %v1983_v44 = vpop.f32.mrf.mxu0 }
 0xebf   : > { %v1984_v56 = vadd.f32 %v2423_v55, %v1983_v44 }
 0xec0   : > { %v2605_v57 = vpop.f32.mrf.mxu0 }
 0xec1   : > { %v1992_v58 = vmul.f32 0.70710677, %v1984_v56  ;;  %v1990_v21 = vmul.f32 0.5, %v1984_v56 }
 0xec2   : > { %v1986_v59 = vpop.f32.mrf.mxu0 }
 0xec3   : > { %v1994_v60 = vand.u32 2147483647, %v1992_v58  ;;  %v1987_v61 = vadd.f32 %v2423_v55, %v1986_v59  ;;  %vm2034_vm8 = vcmp.ge.f32.partialorder %v1992_v58, 0.0 }
 0xec4   : > { %v2606_v62 = vpop.f32.mrf.mxu0 }
 0xec5   : > { %v1996_v63 = vmul.f32 0.3275911, %v1994_v60  ;;  %v1993_v0 = vmul.f32 0.70710677, %v1987_v61  ;;  %v2022_v4 = vsub.f32 0.0, %v1994_v60  ;;  %v1991_v41 = vmul.f32 0.5, %v1987_v61 }
 0xec7   : > { %v1998_v1 = vadd.f32 1.0, %v1996_v63  ;;  %v1995_v2 = vand.u32 2147483647, %v1993_v0  ;;  %v2024_v5 = vmul.f32 %v2022_v4, %v1994_v60  ;;  %vm2035_vm9 = vcmp.ge.f32.partialorder %v1993_v0, 0.0 }
 0xec9   : > { %2725 = vrcp.f32 %v1998_v1  ;;  %v1997_v31 = vmul.f32 0.3275911, %v1995_v2  ;;  %v2023_v6 = vsub.f32 0.0, %v1995_v2  ;;  %v2026_v9 = vmul.f32 1.442695, %v2024_v5 }
 0xecb   : > { %v1999_v3 = vadd.f32 1.0, %v1997_v31  ;;  %v2025_v10 = vmul.f32 %v2023_v6, %v1995_v2 }
 0xecd   : > { %2727 = vrcp.f32 %v1999_v3  ;;  %v2028_v15 = vmul.f32 1.442695, %v2025_v10 }
 0xece   : > { %2729 = vpow2.f32 %v2026_v9 }
 0xecf   : > { %2731 = vpow2.f32 %v2028_v15 }
 0xed6   : > { %v2726_v7 = vpop.eup %2725 }
 0xed7   : > { %v2004_v8 = vmul.f32 1.0614054, %v2726_v7 }
 0xed9   : > { %v2006_v11 = vadd.f32 -1.4531521, %v2004_v8 }
 0xeda   : > { %v2728_v12 = vpop.eup %2727 }
 0xedb   : > { %v2008_v13 = vmul.f32 %v2726_v7, %v2006_v11  ;;  %v2005_v14 = vmul.f32 1.0614054, %v2728_v12  ;;  %v2730_v29 = vpop.eup %2729  ;;  %v2433_v11 = vld [vmem:[%s738_s2] ss:$0 sm:$0xff] }
 0xedc   : > { %v2732_v32 = vpop.eup %2731 }
 0xedd   : > { %v2010_v16 = vadd.f32 1.4214138, %v2008_v13  ;;  %v2007_v17 = vadd.f32 -1.4531521, %v2005_v14  ;;  %v2434_v13 = vld [vmem:[%s741_s10] ss:$0 sm:$0xff] }
 0xedf   : > { %v2012_v19 = vmul.f32 %v2726_v7, %v2010_v16  ;;  %v2009_v20 = vmul.f32 %v2728_v12, %v2007_v17 }
 0xee1   : > { %v2014_v22 = vadd.f32 -0.28449672, %v2012_v19  ;;  %v2011_v23 = vadd.f32 1.4214138, %v2009_v20 }
 0xee3   : > { %v2016_v24 = vmul.f32 %v2726_v7, %v2014_v22  ;;  %v2013_v25 = vmul.f32 %v2728_v12, %v2011_v23 }
 0xee5   : > { %v2018_v26 = vadd.f32 0.2548296, %v2016_v24  ;;  %v2015_v27 = vadd.f32 -0.28449672, %v2013_v25 }
 0xee7   : > { %v2020_v33 = vmul.f32 %v2726_v7, %v2018_v26  ;;  %v2017_v28 = vmul.f32 %v2728_v12, %v2015_v27 }
 0xee9   : > { %v2030_v30 = vmul.f32 %v2730_v29, %v2020_v33  ;;  %v2019_v34 = vadd.f32 0.2548296, %v2017_v28 }
 0xeeb   : > { %v2032_v49 = vsub.f32 1.0, %v2030_v30  ;;  %v2021_v53 = vmul.f32 %v2728_v12, %v2019_v34 }
 0xeed   : > { %v2036_v35 = vsub.f32 0.0, %v2032_v49  ;;  %v2031_v36 = vmul.f32 %v2732_v32, %v2021_v53 }
 0xeef   : > { %v2038_v37 = vsel %vm2034_vm8, %v2032_v49, %v2036_v35  ;;  %v2033_v38 = vsub.f32 1.0, %v2031_v36 }
 0xef0   : > { %v2040_v40 = vadd.f32 1.0, %v2038_v37 }
 0xef1   : > { %v2037_v39 = vsub.f32 0.0, %v2033_v38 }
 0xef2   : > { %v2042_v43 = vmul.f32 %v2040_v40, %v1990_v21 }
 0xef3   : > { %v2039_v18 = vsel %vm2035_vm9, %v2033_v38, %v2037_v39 }
 0xef4   : > { %v2041_v42 = vadd.f32 1.0, %v2039_v18 }
 0xef6   : > { %v2043_v45 = vmul.f32 %v2041_v42, %v1991_v41 }
 0xef8   : > { %v2044_v48 = vpack.c.bf16 %v2043_v45, %v2042_v43 }
 0xefa   : > { %2616 = vmatmul.mubr.msk.bf16.vlgmr.msra.gmra.mxu1 %vm2084_vm10, %v2044_v48 }
 0xfba   : > { %v2122_v51 = vpop.f32.mrf.mxu1 }
 0xfbb   : > { %v2123_v52 = vadd.f32 %v2427_v50, %v2122_v51 }
 0xfbc   : > { %v2617_v54 = vpop.f32.mrf.mxu1 }
 0xfbd   : > { %v2129_v55 = vadd.f32 %v2123_v52, %v3203_v46 }
 0xfbe   : > { %v2125_v44 = vpop.f32.mrf.mxu1 }
 0xfbf   : > { %v2126_v57 = vadd.f32 %v2427_v50, %v2125_v44  ;;  %v2133_v56 = vsel %vm831_vm2, %v2129_v55, 0.0 }
 0xfc0   : > { %2134 = vadd.xlane.f32.xlu1 %v2133_v56  ;;  %v2618_v58 = vpop.f32.mrf.mxu1 }
 0xfc1   : > { %v2130_v59 = vadd.f32 %v2126_v57, %v3205_v47 }
 0xfc3   : > { %v2136_v60 = vsel %vm831_vm2, %v2130_v59, 0.0 }
 0xfc4   : > { %2137 = vadd.xlane.f32.xlu0 %v2136_v60 }
0x1049   : > { %v2135_v61 = vpop.xlane.xlu1 %2134 }
0x104a   : > { %v2139_v62 = vmul.f32 0.03125, %v2135_v61 }
0x104c   : > { %v2141_v63 = vsub.f32 %v2129_v55, %v2139_v62 }
0x104d   : > { %v2138_v0 = vpop.xlane.xlu0 %2137 }
0x104e   : > { %v2140_v1 = vmul.f32 0.03125, %v2138_v0  ;;  %v2143_v2 = vmul.f32 %v2141_v63, %v2141_v63 }
0x1050   : > { %v2142_v31 = vsub.f32 %v2130_v59, %v2140_v1  ;;  %v2145_v46 = vsel %vm831_vm2, %v2143_v2, 0.0 }
0x1051   : > { %2146 = vadd.xlane.f32.xlu1 %v2145_v46 }
0x1052   : > { %v2144_v3 = vmul.f32 %v2142_v31, %v2142_v31 }
0x1054   : > { %v2148_v4 = vsel %vm831_vm2, %v2144_v3, 0.0 }
0x1055   : > { %2149 = vadd.xlane.f32.xlu0 %v2148_v4 }
0x10da   : > { %v2147_v47 = vpop.xlane.xlu1 %2146 }
0x10db   : > { %v2151_v5 = vmul.f32 0.03125, %v2147_v47 }
0x10dd   : > { %v2153_v6 = vadd.f32 1e-12, %v2151_v5 }
0x10de   : > { %v2150_v7 = vpop.xlane.xlu0 %2149 }
0x10df   : > { %2733 = vrsqrt.f32 %v2153_v6  ;;  %v2152_v8 = vmul.f32 0.03125, %v2150_v7 }
0x10e1   : > { %v2154_v9 = vadd.f32 1e-12, %v2152_v8 }
0x10e3   : > { %2735 = vrsqrt.f32 %v2154_v9 }
0x10ec   : > { %v2734_v10 = vpop.eup %2733 }
0x10ed   : > { %v2157_v12 = vmul.f32 %v2734_v10, %v2141_v63 }
0x10ef   : > { %v2165_v14 = vmul.f32 %v2433_v11, %v2157_v12 }
0x10f0   : > { %v2736_v15 = vpop.eup %2735 }
0x10f1   : > { %v2173_v16 = vadd.f32 %v2434_v13, %v2165_v14  ;;  %v2158_v17 = vmul.f32 %v2736_v15, %v2142_v31 }
0x10f3   : > { %2175 = vst.msk [vmem:[%s2979_s11] sm:$0xff] %vm831_vm2, %v2173_v16  ;;  %v2166_v19 = vmul.f32 %v2433_v11, %v2158_v17 }
0x10f5   : > { %v2174_v20 = vadd.f32 %v2434_v13, %v2166_v19 }
0x10f7   : > { %2176 = vst.msk [vmem:[%s2979_s11 + $0x8] sm:$0xff] %vm831_vm2, %v2174_v20 }
0x10f8 PF: > { %s3320_s28 = sld [smem:[#allocation6_spill]] }
0x10f9   : > { %s3321_s21 = sld [smem:[#allocation4_spill]] }
0x10fa   : > { %s3322_s22 = sld [smem:[#allocation5_spill]] }
0x10fb   : > { %s3323_s23 = sld [smem:[#allocation7_spill]] }
0x10fc   : > { %s3324_s24 = sld [smem:[#allocation8_spill]] }
0x10fe   : > { %s26_s25 = sadd.s32 1, %s3320_s28  }
0x10ff   : > { %p23_p8 = scmp.ge.s32.totalorder %s26_s25, 6  }
0x1101   :  { %25 = sbr.rel (!%p23_p8) target bundleno = 11 (0xb), region = 157 }

</bundles_post_ra>
